<compile_context>
chip_gen: v6e
topology: v6e:2x2x1
jax: 0.10.0
libtpu: 0.0.40
codegen_flags: <defaults>
</compile_context>

<pallas_src>
import functools

import jax
import jax.numpy as jnp
from jax import lax
from jax.experimental import pallas as pl
from jax.experimental.pallas import tpu as pltpu

BN_EPS = 1e-5
LANE = 128
GBN_VBS = 128          # ghost batch norm virtual batch size


def _round_up(x, m):
    return ((x + m - 1) // m) * m


# ----------------------------------------------------------------------------- fused kernel

def _make_fused_kernel(*, n_enc, n_dec, tb, batch, cat_segments, compute_dtype):
    """One grid step == one ghost-batch chunk, full network in VMEM."""

    def kernel(*refs):
        it = iter(refs)
        x_ref = next(it)
        enc = [tuple(next(it) for _ in range(5)) for _ in range(n_enc)]
        w_eo, b_eo = next(it), next(it)
        dec = [tuple(next(it) for _ in range(5)) for _ in range(n_dec)]
        w_hd, b_hd = next(it), next(it)
        z_ref, xhat_ref = next(it), next(it)

        # valid-row mask for this ghost chunk (padded batch rows must not skew BN stats)
        i = pl.program_id(0)
        rows_valid = jnp.minimum(tb, batch - i * tb)
        inv_n = 1.0 / rows_valid.astype(jnp.float32)
        rmask = (lax.broadcasted_iota(jnp.int32, (tb, 1), 0) < rows_valid).astype(jnp.float32)

        def linear(h, w_ref, b_ref):
            return jnp.dot(h.astype(compute_dtype), w_ref[...],
                           preferred_element_type=jnp.float32) + b_ref[...]

        def block(h, w_ref, b_ref, g_ref, beta_ref, a_ref):
            y = linear(h, w_ref, b_ref)
            # GBN (training mode, this chunk's stats), folded into one scale/shift.
            mu = jnp.sum(y * rmask, axis=0, keepdims=True) * inv_n
            var = jnp.maximum(
                jnp.sum(y * y * rmask, axis=0, keepdims=True) * inv_n - mu * mu, 0.0)
            scale = g_ref[...] * lax.rsqrt(var + BN_EPS)
            shift = beta_ref[...] - mu * scale
            yn = y * scale + shift
            # per-channel PReLU
            return jnp.where(yn >= 0.0, yn, a_ref[...] * yn)

        # encoder
        h = x_ref[...]
        for blk in enc:
            h = block(h, *blk)
        z = linear(h, w_eo, b_eo)
        z_ref[...] = z                      # lane-padded latent; wrapper slices [:, :latent]

        # decoder
        d = z
        for blk in dec:
            d = block(d, *blk)

        # fused heads: one wide matmul, then per-segment log_softmax via lane masks
        yh = linear(d, w_hd, b_hd)
        P = yh.shape[1]
        col = lax.broadcasted_iota(jnp.int32, (1, P), 1)
        lse_map = jnp.zeros_like(yh)
        for (s, e) in cat_segments:
            m = (col >= s) & (col < e)
            mx = jnp.max(jnp.where(m, yh, -jnp.inf), axis=1, keepdims=True)
            p = jnp.exp(jnp.where(m, yh - mx, -jnp.inf))
            lse = jnp.log(jnp.sum(p, axis=1, keepdims=True)) + mx
            lse_map = jnp.where(m, lse, lse_map)
        xhat_ref[...] = yh - lse_map        # continuous / padded lanes: lse_map == 0

    return kernel


# ----------------------------------------------------------------------------- params

def _init_linear_raw(key, din, dout):
    # torch nn.Linear default init (weight_init callback of the source module is not shown)
    kw, kb = jax.random.split(key)
    lim = 1.0 / (din ** 0.5)
    w = jax.random.uniform(kw, (din, dout), jnp.float32, -lim, lim)
    b = jax.random.uniform(kb, (dout,), jnp.float32, -lim, lim)
    return w, b


def _pad_wb(w, b, din_pad, dout_pad, compute_dtype):
    wp = jnp.zeros((din_pad, dout_pad), jnp.float32).at[:w.shape[0], :w.shape[1]].set(w)
    bp = jnp.zeros((1, dout_pad), jnp.float32).at[0, :b.shape[0]].set(b)
    return wp.astype(compute_dtype), bp


def _init_block(key, din, dout, din_pad, dout_pad, compute_dtype):
    """Linear + GBN + PReLU parameter bundle, zero-padded to lane-dense shapes."""
    w, b = _init_linear_raw(key, din, dout)
    wp, bp = _pad_wb(w, b, din_pad, dout_pad, compute_dtype)
    gamma = jnp.zeros((1, dout_pad), jnp.float32).at[0, :dout].set(1.0)
    beta = jnp.zeros((1, dout_pad), jnp.float32)
    alpha = jnp.zeros((1, dout_pad), jnp.float32).at[0, :dout].set(0.25)  # torch PReLU default
    return (wp, bp, gamma, beta, alpha)


def build_ae_params(key, categorical_features, categorical_dims, continuous_features,
                    latent_dim=32, hidden_dim=(128, 128, 128),
                    compute_dtype=jnp.bfloat16):
    cat = sorted(zip(categorical_features, categorical_dims)) if categorical_features else []
    cat_feats = [c[0] for c in cat]
    cat_dims = [c[1] for c in cat]
    cont_feats = sorted(continuous_features)
    n_cont = len(cont_feats)
    input_dim = n_cont + len(cat_feats)
    hidden_dim = list(hidden_dim)

    emb_dims = [min(50, (n + 1) // 2) for n in cat_dims]
    post_embed_dim = n_cont + sum(emb_dims)

    # lane-dense (padded) dims
    pe_pad = _round_up(post_embed_dim, LANE)
    hid_pad = [_round_up(h, LANE) for h in hidden_dim]
    lat_pad = _round_up(latent_dim, LANE)

    keys = iter(jax.random.split(key, 128))

    emb_tables = {f: 0.1 * jax.random.normal(next(keys), (n, d), jnp.float32)
                  for f, n, d in zip(cat_feats, cat_dims, emb_dims)}

    dims = [post_embed_dim] + hidden_dim
    dims_pad = [pe_pad] + hid_pad
    enc_layers = [_init_block(next(keys), dims[i - 1], dims[i],
                              dims_pad[i - 1], dims_pad[i], compute_dtype)
                  for i in range(1, len(dims))]
    enc_out = _pad_wb(*_init_linear_raw(next(keys), dims[-1], latent_dim),
                      dims_pad[-1], lat_pad, compute_dtype)

    full = dims + [latent_dim]
    full_pad = dims_pad + [lat_pad]
    dec_layers = [_init_block(next(keys), full[i], full[i - 1],
                              full_pad[i], full_pad[i - 1], compute_dtype)
                  for i in range(len(full) - 1, 1, -1)]

    # fused heads: columns = [cont_net | cat_net_0 | cat_net_1 | ...], padded to LANE multiple
    head_in, head_in_pad = dims[1], dims_pad[1]
    head_ws, head_bs, cat_segments, off = [], [], [], 0
    if n_cont:
        w, b = _init_linear_raw(next(keys), head_in, n_cont)
        head_ws.append(w); head_bs.append(b)
        off += n_cont
    for n in cat_dims:
        w, b = _init_linear_raw(next(keys), head_in, n)
        head_ws.append(w); head_bs.append(b)
        cat_segments.append((off, off + n))
        off += n
    head_total = off
    head_pad = _round_up(max(head_total, 1), LANE)
    w_cat = jnp.concatenate(head_ws, axis=1)
    b_cat = jnp.concatenate(head_bs, axis=0)
    head_w, head_b = _pad_wb(w_cat, b_cat, head_in_pad, head_pad, compute_dtype)

    cfg = dict(input_dim=input_dim, cat_feats=cat_feats, cat_dims=cat_dims,
               cont_feats=cont_feats, n_cont=n_cont,
               post_embed_dim=post_embed_dim, pe_pad=pe_pad,
               latent_dim=latent_dim, lat_pad=lat_pad,
               head_total=head_total, head_pad=head_pad,
               cat_segments=tuple(cat_segments),
               compute_dtype=compute_dtype)
    return dict(cfg=cfg, emb_tables=emb_tables, enc_layers=enc_layers,
                enc_out=enc_out, dec_layers=dec_layers,
                head_w=head_w, head_b=head_b)


# ----------------------------------------------------------------------------- forward

def ae_forward(params, x):
    cfg = params["cfg"]
    B = x.shape[0]

    # -- EmbeddingGenerator glue (tiny data-dependent gathers stay in XLA) --------------
    # Layout convention: [continuous cols (sorted) | embeddings of categorical cols
    # (sorted)].  The first encoder weight is initialised against this layout, so the
    # end-to-end function is of the same family as the torch module (which interleaves
    # columns in original order).
    parts = []
    if cfg["n_cont"]:
        parts.append(jnp.take(x, jnp.asarray(cfg["cont_feats"], jnp.int32), axis=1))
    for f in cfg["cat_feats"]:
        idx = x[:, f].astype(jnp.int32)
        parts.append(jnp.take(params["emb_tables"][f], idx, axis=0))
    h = parts[0] if len(parts) == 1 else jnp.concatenate(parts, axis=1)

    # -- pad to lane-dense, ghost-batch-tiled layout -------------------------------------
    tb = GBN_VBS if B > GBN_VBS else _round_up(max(B, 1), 8)
    b_pad = _round_up(B, tb)
    h = jnp.pad(h.astype(jnp.float32),
                ((0, b_pad - B), (0, cfg["pe_pad"] - cfg["post_embed_dim"])))

    n_enc = len(params["enc_layers"])
    n_dec = len(params["dec_layers"])
    kernel = _make_fused_kernel(n_enc=n_enc, n_dec=n_dec, tb=tb, batch=B,
                                cat_segments=cfg["cat_segments"],
                                compute_dtype=cfg["compute_dtype"])

    inputs = [h]
    in_specs = [pl.BlockSpec((tb, cfg["pe_pad"]), lambda i: (i, 0))]

    def add_param(a):
        inputs.append(a)
        in_specs.append(pl.BlockSpec(a.shape, lambda i: (0, 0)))

    for blk in params["enc_layers"]:
        for a in blk:
            add_param(a)
    add_param(params["enc_out"][0])
    add_param(params["enc_out"][1])
    for blk in params["dec_layers"]:
        for a in blk:
            add_param(a)
    add_param(params["head_w"])
    add_param(params["head_b"])

    out_shape = (jax.ShapeDtypeStruct((b_pad, cfg["lat_pad"]), jnp.float32),
                 jax.ShapeDtypeStruct((b_pad, cfg["head_pad"]), jnp.float32))
    out_specs = [pl.BlockSpec((tb, cfg["lat_pad"]), lambda i: (i, 0)),
                 pl.BlockSpec((tb, cfg["head_pad"]), lambda i: (i, 0))]

    # advisory cost estimate (matmuls dominate)
    mm_shapes = ([blk[0].shape for blk in params["enc_layers"]]
                 + [params["enc_out"][0].shape]
                 + [blk[0].shape for blk in params["dec_layers"]]
                 + [params["head_w"].shape])
    flops = 2 * b_pad * sum(int(a) * int(b) for a, b in mm_shapes)
    transcendentals = b_pad * (sum(int(blk[0].shape[1]) for blk in params["enc_layers"])
                               + sum(int(blk[0].shape[1]) for blk in params["dec_layers"])
                               + int(cfg["head_pad"]))
    bytes_accessed = (sum(int(a.size) * a.dtype.itemsize for a in inputs)
                      + b_pad * (cfg["lat_pad"] + cfg["head_pad"]) * 4)
    cost = pl.CostEstimate(flops=flops, transcendentals=transcendentals,
                           bytes_accessed=bytes_accessed)

    z_pad, xhat_pad = pl.pallas_call(
        kernel,
        out_shape=out_shape,
        grid_spec=pltpu.PrefetchScalarGridSpec(
            num_scalar_prefetch=0,
            grid=(b_pad // tb,),
            in_specs=in_specs,
            out_specs=out_specs),
        compiler_params=pltpu.CompilerParams(
            dimension_semantics=("parallel",),          # v7x: split chunks over both TCs
            vmem_limit_bytes=64 * 1024 * 1024),
        cost_estimate=cost,
    )(*inputs)

    z = z_pad[:B, :cfg["latent_dim"]]
    xh = xhat_pad[:B, :cfg["head_total"]]
    x_hat = []
    if cfg["n_cont"]:
        x_hat.append(xh[:, :cfg["n_cont"]])
    for (s, e) in cfg["cat_segments"]:
        x_hat.append(xh[:, s:e])
    return x_hat, z


# ----------------------------------------------------------------------------- main

if __name__ == "__main__":
    key = jax.random.PRNGKey(0)
    k_param, k_cont, k_cat = jax.random.split(key, 3)

    # small config: 4 features -> continuous at [0, 2], categorical at [1, 3]
    categorical_features = [1, 3]
    categorical_dims = [5, 7]
    continuous_features = [0, 2]
    B = 8

    params = build_ae_params(k_param, categorical_features, categorical_dims,
                             continuous_features, latent_dim=32,
                             hidden_dim=(128, 128, 128))

    # build input: continuous columns are floats, categorical columns hold integer codes
    x = jnp.zeros((B, 4), jnp.float32)
    cont_vals = jax.random.normal(k_cont, (B, 2), jnp.float32)
    x = x.at[:, 0].set(cont_vals[:, 0]).at[:, 2].set(cont_vals[:, 1])
    cat1 = jax.random.randint(k_cat, (B,), 0, 5)
    cat3 = jax.random.randint(jax.random.fold_in(k_cat, 1), (B,), 0, 7)
    x = x.at[:, 1].set(cat1.astype(jnp.float32)).at[:, 3].set(cat3.astype(jnp.float32))

    fwd = jax.jit(functools.partial(ae_forward, params))
    x_hat, z = fwd(x)
    jax.block_until_ready(z)
    for a in x_hat:
        jax.block_until_ready(a)

    assert z.shape == (B, 32)
    assert x_hat[0].shape == (B, 2)          # continuous reconstruction
    assert x_hat[1].shape == (B, 5)          # log-probs for cat feature 1
    assert x_hat[2].shape == (B, 7)          # log-probs for cat feature 3
    # log_softmax sanity: probabilities of each categorical head sum to 1
    assert bool(jnp.all(jnp.abs(jnp.sum(jnp.exp(x_hat[1]), axis=1) - 1.0) < 1e-3))
    assert bool(jnp.all(jnp.abs(jnp.sum(jnp.exp(x_hat[2]), axis=1) - 1.0) < 1e-3))
    print("KERNEL_OK")
</pallas_src>

<mosaic_0001>
module attributes {stable_mosaic.version = 11 : i64} {
  func.func @kernel(%arg0: i32, %arg1: memref<8x128xf32, #tpu.memory_space<vmem>>, %arg2: memref<128x128xbf16, #tpu.memory_space<vmem>>, %arg3: memref<1x128xf32, #tpu.memory_space<vmem>>, %arg4: memref<1x128xf32, #tpu.memory_space<vmem>>, %arg5: memref<1x128xf32, #tpu.memory_space<vmem>>, %arg6: memref<1x128xf32, #tpu.memory_space<vmem>>, %arg7: memref<128x128xbf16, #tpu.memory_space<vmem>>, %arg8: memref<1x128xf32, #tpu.memory_space<vmem>>, %arg9: memref<1x128xf32, #tpu.memory_space<vmem>>, %arg10: memref<1x128xf32, #tpu.memory_space<vmem>>, %arg11: memref<1x128xf32, #tpu.memory_space<vmem>>, %arg12: memref<128x128xbf16, #tpu.memory_space<vmem>>, %arg13: memref<1x128xf32, #tpu.memory_space<vmem>>, %arg14: memref<1x128xf32, #tpu.memory_space<vmem>>, %arg15: memref<1x128xf32, #tpu.memory_space<vmem>>, %arg16: memref<1x128xf32, #tpu.memory_space<vmem>>, %arg17: memref<128x128xbf16, #tpu.memory_space<vmem>>, %arg18: memref<1x128xf32, #tpu.memory_space<vmem>>, %arg19: memref<128x128xbf16, #tpu.memory_space<vmem>>, %arg20: memref<1x128xf32, #tpu.memory_space<vmem>>, %arg21: memref<1x128xf32, #tpu.memory_space<vmem>>, %arg22: memref<1x128xf32, #tpu.memory_space<vmem>>, %arg23: memref<1x128xf32, #tpu.memory_space<vmem>>, %arg24: memref<128x128xbf16, #tpu.memory_space<vmem>>, %arg25: memref<1x128xf32, #tpu.memory_space<vmem>>, %arg26: memref<1x128xf32, #tpu.memory_space<vmem>>, %arg27: memref<1x128xf32, #tpu.memory_space<vmem>>, %arg28: memref<1x128xf32, #tpu.memory_space<vmem>>, %arg29: memref<128x128xbf16, #tpu.memory_space<vmem>>, %arg30: memref<1x128xf32, #tpu.memory_space<vmem>>, %arg31: memref<1x128xf32, #tpu.memory_space<vmem>>, %arg32: memref<1x128xf32, #tpu.memory_space<vmem>>, %arg33: memref<1x128xf32, #tpu.memory_space<vmem>>, %arg34: memref<128x128xbf16, #tpu.memory_space<vmem>>, %arg35: memref<1x128xf32, #tpu.memory_space<vmem>>, %arg36: memref<8x128xf32, #tpu.memory_space<vmem>>, %arg37: memref<8x128xf32, #tpu.memory_space<vmem>>) attributes {dimension_semantics = [#tpu.dimension_semantics<parallel>], iteration_bounds = array<i64: 1>, scalar_prefetch = 0 : i64, scratch_operands = 0 : i64, tpu.core_type = #tpu.core_type<tc>, window_params = [{transform_indices = @transform_0, window_bounds = array<i64: 8, 128>}, {pipeline_mode = #tpu.pipeline_mode<synchronous>, transform_indices = @transform_1, window_bounds = array<i64: 128, 128>}, {pipeline_mode = #tpu.pipeline_mode<synchronous>, transform_indices = @transform_2, window_bounds = array<i64: 1, 128>}, {pipeline_mode = #tpu.pipeline_mode<synchronous>, transform_indices = @transform_3, window_bounds = array<i64: 1, 128>}, {pipeline_mode = #tpu.pipeline_mode<synchronous>, transform_indices = @transform_4, window_bounds = array<i64: 1, 128>}, {pipeline_mode = #tpu.pipeline_mode<synchronous>, transform_indices = @transform_5, window_bounds = array<i64: 1, 128>}, {pipeline_mode = #tpu.pipeline_mode<synchronous>, transform_indices = @transform_6, window_bounds = array<i64: 128, 128>}, {pipeline_mode = #tpu.pipeline_mode<synchronous>, transform_indices = @transform_7, window_bounds = array<i64: 1, 128>}, {pipeline_mode = #tpu.pipeline_mode<synchronous>, transform_indices = @transform_8, window_bounds = array<i64: 1, 128>}, {pipeline_mode = #tpu.pipeline_mode<synchronous>, transform_indices = @transform_9, window_bounds = array<i64: 1, 128>}, {pipeline_mode = #tpu.pipeline_mode<synchronous>, transform_indices = @transform_10, window_bounds = array<i64: 1, 128>}, {pipeline_mode = #tpu.pipeline_mode<synchronous>, transform_indices = @transform_11, window_bounds = array<i64: 128, 128>}, {pipeline_mode = #tpu.pipeline_mode<synchronous>, transform_indices = @transform_12, window_bounds = array<i64: 1, 128>}, {pipeline_mode = #tpu.pipeline_mode<synchronous>, transform_indices = @transform_13, window_bounds = array<i64: 1, 128>}, {pipeline_mode = #tpu.pipeline_mode<synchronous>, transform_indices = @transform_14, window_bounds = array<i64: 1, 128>}, {pipeline_mode = #tpu.pipeline_mode<synchronous>, transform_indices = @transform_15, window_bounds = array<i64: 1, 128>}, {pipeline_mode = #tpu.pipeline_mode<synchronous>, transform_indices = @transform_16, window_bounds = array<i64: 128, 128>}, {pipeline_mode = #tpu.pipeline_mode<synchronous>, transform_indices = @transform_17, window_bounds = array<i64: 1, 128>}, {pipeline_mode = #tpu.pipeline_mode<synchronous>, transform_indices = @transform_18, window_bounds = array<i64: 128, 128>}, {pipeline_mode = #tpu.pipeline_mode<synchronous>, transform_indices = @transform_19, window_bounds = array<i64: 1, 128>}, {pipeline_mode = #tpu.pipeline_mode<synchronous>, transform_indices = @transform_20, window_bounds = array<i64: 1, 128>}, {pipeline_mode = #tpu.pipeline_mode<synchronous>, transform_indices = @transform_21, window_bounds = array<i64: 1, 128>}, {pipeline_mode = #tpu.pipeline_mode<synchronous>, transform_indices = @transform_22, window_bounds = array<i64: 1, 128>}, {pipeline_mode = #tpu.pipeline_mode<synchronous>, transform_indices = @transform_23, window_bounds = array<i64: 128, 128>}, {pipeline_mode = #tpu.pipeline_mode<synchronous>, transform_indices = @transform_24, window_bounds = array<i64: 1, 128>}, {pipeline_mode = #tpu.pipeline_mode<synchronous>, transform_indices = @transform_25, window_bounds = array<i64: 1, 128>}, {pipeline_mode = #tpu.pipeline_mode<synchronous>, transform_indices = @transform_26, window_bounds = array<i64: 1, 128>}, {pipeline_mode = #tpu.pipeline_mode<synchronous>, transform_indices = @transform_27, window_bounds = array<i64: 1, 128>}, {pipeline_mode = #tpu.pipeline_mode<synchronous>, transform_indices = @transform_28, window_bounds = array<i64: 128, 128>}, {pipeline_mode = #tpu.pipeline_mode<synchronous>, transform_indices = @transform_29, window_bounds = array<i64: 1, 128>}, {pipeline_mode = #tpu.pipeline_mode<synchronous>, transform_indices = @transform_30, window_bounds = array<i64: 1, 128>}, {pipeline_mode = #tpu.pipeline_mode<synchronous>, transform_indices = @transform_31, window_bounds = array<i64: 1, 128>}, {pipeline_mode = #tpu.pipeline_mode<synchronous>, transform_indices = @transform_32, window_bounds = array<i64: 1, 128>}, {pipeline_mode = #tpu.pipeline_mode<synchronous>, transform_indices = @transform_33, window_bounds = array<i64: 128, 128>}, {pipeline_mode = #tpu.pipeline_mode<synchronous>, transform_indices = @transform_34, window_bounds = array<i64: 1, 128>}, {transform_indices = @transform_35, window_bounds = array<i64: 8, 128>}, {transform_indices = @transform_36, window_bounds = array<i64: 8, 128>}]} {
    %c8_i32 = arith.constant 8 : i32
    %0 = arith.muli %arg0, %c8_i32 : i32
    %c8_i32_0 = arith.constant 8 : i32
    %1 = arith.subi %c8_i32_0, %0 : i32
    %c8_i32_1 = arith.constant 8 : i32
    %2 = arith.minsi %c8_i32_1, %1 : i32
    %3 = arith.sitofp %2 : i32 to f32
    %cst = arith.constant 1.000000e+00 : f32
    %4 = arith.divf %cst, %3 : f32
    %5 = tpu.iota {dimensions = array<i32: 0>} : vector<8x1xi32>
    %6 = vector.broadcast %2 : i32 to vector<8x1xi32>
    %7 = arith.cmpi slt, %5, %6 : vector<8x1xi32>
    %8 = arith.extui %7 : vector<8x1xi1> to vector<8x1xi32>
    %9 = arith.sitofp %8 : vector<8x1xi32> to vector<8x1xf32>
    %c0 = arith.constant 0 : index
    %c0_2 = arith.constant 0 : index
    %10 = vector.load %arg1[%c0, %c0_2] : memref<8x128xf32, #tpu.memory_space<vmem>>, vector<8x128xf32>
    %11 = arith.truncf %10 : vector<8x128xf32> to vector<8x128xbf16>
    %c0_3 = arith.constant 0 : index
    %c0_4 = arith.constant 0 : index
    %12 = vector.load %arg2[%c0_3, %c0_4] : memref<128x128xbf16, #tpu.memory_space<vmem>>, vector<128x128xbf16>
    %cst_5 = arith.constant dense<0.000000e+00> : vector<8x128xf32>
    %13 = tpu.matmul %11, %12, %cst_5 {dimension_numbers = #tpu.dot_dimension_numbers<[1], [0], [0], [1], [0, 0, 1, 1], [], []>} : vector<8x128xbf16>, vector<128x128xbf16>, vector<8x128xf32> -> vector<8x128xf32>
    %c0_6 = arith.constant 0 : index
    %c0_7 = arith.constant 0 : index
    %14 = vector.load %arg3[%c0_6, %c0_7] : memref<1x128xf32, #tpu.memory_space<vmem>>, vector<1x128xf32>
    %15 = vector.broadcast %14 : vector<1x128xf32> to vector<8x128xf32>
    %16 = arith.addf %13, %15 : vector<8x128xf32>
    %17 = vector.broadcast %9 : vector<8x1xf32> to vector<8x128xf32>
    %18 = arith.mulf %16, %17 : vector<8x128xf32>
    %cst_8 = arith.constant dense<0.000000e+00> : vector<128xf32>
    %19 = vector.multi_reduction <add>, %18, %cst_8 [0] : vector<8x128xf32> to vector<128xf32>
    %20 = vector.shape_cast %19 : vector<128xf32> to vector<1x128xf32>
    %21 = vector.broadcast %4 : f32 to vector<1x128xf32>
    %22 = arith.mulf %20, %21 : vector<1x128xf32>
    %23 = arith.mulf %16, %16 : vector<8x128xf32>
    %24 = vector.broadcast %9 : vector<8x1xf32> to vector<8x128xf32>
    %25 = arith.mulf %23, %24 : vector<8x128xf32>
    %cst_9 = arith.constant dense<0.000000e+00> : vector<128xf32>
    %26 = vector.multi_reduction <add>, %25, %cst_9 [0] : vector<8x128xf32> to vector<128xf32>
    %27 = vector.shape_cast %26 : vector<128xf32> to vector<1x128xf32>
    %28 = vector.broadcast %4 : f32 to vector<1x128xf32>
    %29 = arith.mulf %27, %28 : vector<1x128xf32>
    %30 = arith.mulf %22, %22 : vector<1x128xf32>
    %31 = arith.subf %29, %30 : vector<1x128xf32>
    %cst_10 = arith.constant 0.000000e+00 : f32
    %32 = vector.broadcast %cst_10 : f32 to vector<1x128xf32>
    %33 = arith.maximumf %31, %32 : vector<1x128xf32>
    %c0_11 = arith.constant 0 : index
    %c0_12 = arith.constant 0 : index
    %34 = vector.load %arg4[%c0_11, %c0_12] : memref<1x128xf32, #tpu.memory_space<vmem>>, vector<1x128xf32>
    %cst_13 = arith.constant 9.99999974E-6 : f32
    %35 = vector.broadcast %cst_13 : f32 to vector<1x128xf32>
    %36 = arith.addf %33, %35 : vector<1x128xf32>
    %37 = math.rsqrt %36 : vector<1x128xf32>
    %38 = arith.mulf %34, %37 : vector<1x128xf32>
    %c0_14 = arith.constant 0 : index
    %c0_15 = arith.constant 0 : index
    %39 = vector.load %arg5[%c0_14, %c0_15] : memref<1x128xf32, #tpu.memory_space<vmem>>, vector<1x128xf32>
    %40 = arith.mulf %22, %38 : vector<1x128xf32>
    %41 = arith.subf %39, %40 : vector<1x128xf32>
    %42 = vector.broadcast %38 : vector<1x128xf32> to vector<8x128xf32>
    %43 = arith.mulf %16, %42 : vector<8x128xf32>
    %44 = vector.broadcast %41 : vector<1x128xf32> to vector<8x128xf32>
    %45 = arith.addf %43, %44 : vector<8x128xf32>
    %cst_16 = arith.constant 0.000000e+00 : f32
    %46 = vector.broadcast %cst_16 : f32 to vector<8x128xf32>
    %47 = arith.cmpf oge, %45, %46 : vector<8x128xf32>
    %c0_17 = arith.constant 0 : index
    %c0_18 = arith.constant 0 : index
    %48 = vector.load %arg6[%c0_17, %c0_18] : memref<1x128xf32, #tpu.memory_space<vmem>>, vector<1x128xf32>
    %49 = vector.broadcast %48 : vector<1x128xf32> to vector<8x128xf32>
    %50 = arith.mulf %49, %45 : vector<8x128xf32>
    %51 = arith.select %47, %45, %50 : vector<8x128xi1>, vector<8x128xf32>
    %52 = arith.truncf %51 : vector<8x128xf32> to vector<8x128xbf16>
    %c0_19 = arith.constant 0 : index
    %c0_20 = arith.constant 0 : index
    %53 = vector.load %arg7[%c0_19, %c0_20] : memref<128x128xbf16, #tpu.memory_space<vmem>>, vector<128x128xbf16>
    %cst_21 = arith.constant dense<0.000000e+00> : vector<8x128xf32>
    %54 = tpu.matmul %52, %53, %cst_21 {dimension_numbers = #tpu.dot_dimension_numbers<[1], [0], [0], [1], [0, 0, 1, 1], [], []>} : vector<8x128xbf16>, vector<128x128xbf16>, vector<8x128xf32> -> vector<8x128xf32>
    %c0_22 = arith.constant 0 : index
    %c0_23 = arith.constant 0 : index
    %55 = vector.load %arg8[%c0_22, %c0_23] : memref<1x128xf32, #tpu.memory_space<vmem>>, vector<1x128xf32>
    %56 = vector.broadcast %55 : vector<1x128xf32> to vector<8x128xf32>
    %57 = arith.addf %54, %56 : vector<8x128xf32>
    %58 = vector.broadcast %9 : vector<8x1xf32> to vector<8x128xf32>
    %59 = arith.mulf %57, %58 : vector<8x128xf32>
    %cst_24 = arith.constant dense<0.000000e+00> : vector<128xf32>
    %60 = vector.multi_reduction <add>, %59, %cst_24 [0] : vector<8x128xf32> to vector<128xf32>
    %61 = vector.shape_cast %60 : vector<128xf32> to vector<1x128xf32>
    %62 = vector.broadcast %4 : f32 to vector<1x128xf32>
    %63 = arith.mulf %61, %62 : vector<1x128xf32>
    %64 = arith.mulf %57, %57 : vector<8x128xf32>
    %65 = vector.broadcast %9 : vector<8x1xf32> to vector<8x128xf32>
    %66 = arith.mulf %64, %65 : vector<8x128xf32>
    %cst_25 = arith.constant dense<0.000000e+00> : vector<128xf32>
    %67 = vector.multi_reduction <add>, %66, %cst_25 [0] : vector<8x128xf32> to vector<128xf32>
    %68 = vector.shape_cast %67 : vector<128xf32> to vector<1x128xf32>
    %69 = vector.broadcast %4 : f32 to vector<1x128xf32>
    %70 = arith.mulf %68, %69 : vector<1x128xf32>
    %71 = arith.mulf %63, %63 : vector<1x128xf32>
    %72 = arith.subf %70, %71 : vector<1x128xf32>
    %cst_26 = arith.constant 0.000000e+00 : f32
    %73 = vector.broadcast %cst_26 : f32 to vector<1x128xf32>
    %74 = arith.maximumf %72, %73 : vector<1x128xf32>
    %c0_27 = arith.constant 0 : index
    %c0_28 = arith.constant 0 : index
    %75 = vector.load %arg9[%c0_27, %c0_28] : memref<1x128xf32, #tpu.memory_space<vmem>>, vector<1x128xf32>
    %cst_29 = arith.constant 9.99999974E-6 : f32
    %76 = vector.broadcast %cst_29 : f32 to vector<1x128xf32>
    %77 = arith.addf %74, %76 : vector<1x128xf32>
    %78 = math.rsqrt %77 : vector<1x128xf32>
    %79 = arith.mulf %75, %78 : vector<1x128xf32>
    %c0_30 = arith.constant 0 : index
    %c0_31 = arith.constant 0 : index
    %80 = vector.load %arg10[%c0_30, %c0_31] : memref<1x128xf32, #tpu.memory_space<vmem>>, vector<1x128xf32>
    %81 = arith.mulf %63, %79 : vector<1x128xf32>
    %82 = arith.subf %80, %81 : vector<1x128xf32>
    %83 = vector.broadcast %79 : vector<1x128xf32> to vector<8x128xf32>
    %84 = arith.mulf %57, %83 : vector<8x128xf32>
    %85 = vector.broadcast %82 : vector<1x128xf32> to vector<8x128xf32>
    %86 = arith.addf %84, %85 : vector<8x128xf32>
    %cst_32 = arith.constant 0.000000e+00 : f32
    %87 = vector.broadcast %cst_32 : f32 to vector<8x128xf32>
    %88 = arith.cmpf oge, %86, %87 : vector<8x128xf32>
    %c0_33 = arith.constant 0 : index
    %c0_34 = arith.constant 0 : index
    %89 = vector.load %arg11[%c0_33, %c0_34] : memref<1x128xf32, #tpu.memory_space<vmem>>, vector<1x128xf32>
    %90 = vector.broadcast %89 : vector<1x128xf32> to vector<8x128xf32>
    %91 = arith.mulf %90, %86 : vector<8x128xf32>
    %92 = arith.select %88, %86, %91 : vector<8x128xi1>, vector<8x128xf32>
    %93 = arith.truncf %92 : vector<8x128xf32> to vector<8x128xbf16>
    %c0_35 = arith.constant 0 : index
    %c0_36 = arith.constant 0 : index
    %94 = vector.load %arg12[%c0_35, %c0_36] : memref<128x128xbf16, #tpu.memory_space<vmem>>, vector<128x128xbf16>
    %cst_37 = arith.constant dense<0.000000e+00> : vector<8x128xf32>
    %95 = tpu.matmul %93, %94, %cst_37 {dimension_numbers = #tpu.dot_dimension_numbers<[1], [0], [0], [1], [0, 0, 1, 1], [], []>} : vector<8x128xbf16>, vector<128x128xbf16>, vector<8x128xf32> -> vector<8x128xf32>
    %c0_38 = arith.constant 0 : index
    %c0_39 = arith.constant 0 : index
    %96 = vector.load %arg13[%c0_38, %c0_39] : memref<1x128xf32, #tpu.memory_space<vmem>>, vector<1x128xf32>
    %97 = vector.broadcast %96 : vector<1x128xf32> to vector<8x128xf32>
    %98 = arith.addf %95, %97 : vector<8x128xf32>
    %99 = vector.broadcast %9 : vector<8x1xf32> to vector<8x128xf32>
    %100 = arith.mulf %98, %99 : vector<8x128xf32>
    %cst_40 = arith.constant dense<0.000000e+00> : vector<128xf32>
    %101 = vector.multi_reduction <add>, %100, %cst_40 [0] : vector<8x128xf32> to vector<128xf32>
    %102 = vector.shape_cast %101 : vector<128xf32> to vector<1x128xf32>
    %103 = vector.broadcast %4 : f32 to vector<1x128xf32>
    %104 = arith.mulf %102, %103 : vector<1x128xf32>
    %105 = arith.mulf %98, %98 : vector<8x128xf32>
    %106 = vector.broadcast %9 : vector<8x1xf32> to vector<8x128xf32>
    %107 = arith.mulf %105, %106 : vector<8x128xf32>
    %cst_41 = arith.constant dense<0.000000e+00> : vector<128xf32>
    %108 = vector.multi_reduction <add>, %107, %cst_41 [0] : vector<8x128xf32> to vector<128xf32>
    %109 = vector.shape_cast %108 : vector<128xf32> to vector<1x128xf32>
    %110 = vector.broadcast %4 : f32 to vector<1x128xf32>
    %111 = arith.mulf %109, %110 : vector<1x128xf32>
    %112 = arith.mulf %104, %104 : vector<1x128xf32>
    %113 = arith.subf %111, %112 : vector<1x128xf32>
    %cst_42 = arith.constant 0.000000e+00 : f32
    %114 = vector.broadcast %cst_42 : f32 to vector<1x128xf32>
    %115 = arith.maximumf %113, %114 : vector<1x128xf32>
    %c0_43 = arith.constant 0 : index
    %c0_44 = arith.constant 0 : index
    %116 = vector.load %arg14[%c0_43, %c0_44] : memref<1x128xf32, #tpu.memory_space<vmem>>, vector<1x128xf32>
    %cst_45 = arith.constant 9.99999974E-6 : f32
    %117 = vector.broadcast %cst_45 : f32 to vector<1x128xf32>
    %118 = arith.addf %115, %117 : vector<1x128xf32>
    %119 = math.rsqrt %118 : vector<1x128xf32>
    %120 = arith.mulf %116, %119 : vector<1x128xf32>
    %c0_46 = arith.constant 0 : index
    %c0_47 = arith.constant 0 : index
    %121 = vector.load %arg15[%c0_46, %c0_47] : memref<1x128xf32, #tpu.memory_space<vmem>>, vector<1x128xf32>
    %122 = arith.mulf %104, %120 : vector<1x128xf32>
    %123 = arith.subf %121, %122 : vector<1x128xf32>
    %124 = vector.broadcast %120 : vector<1x128xf32> to vector<8x128xf32>
    %125 = arith.mulf %98, %124 : vector<8x128xf32>
    %126 = vector.broadcast %123 : vector<1x128xf32> to vector<8x128xf32>
    %127 = arith.addf %125, %126 : vector<8x128xf32>
    %cst_48 = arith.constant 0.000000e+00 : f32
    %128 = vector.broadcast %cst_48 : f32 to vector<8x128xf32>
    %129 = arith.cmpf oge, %127, %128 : vector<8x128xf32>
    %c0_49 = arith.constant 0 : index
    %c0_50 = arith.constant 0 : index
    %130 = vector.load %arg16[%c0_49, %c0_50] : memref<1x128xf32, #tpu.memory_space<vmem>>, vector<1x128xf32>
    %131 = vector.broadcast %130 : vector<1x128xf32> to vector<8x128xf32>
    %132 = arith.mulf %131, %127 : vector<8x128xf32>
    %133 = arith.select %129, %127, %132 : vector<8x128xi1>, vector<8x128xf32>
    %134 = arith.truncf %133 : vector<8x128xf32> to vector<8x128xbf16>
    %c0_51 = arith.constant 0 : index
    %c0_52 = arith.constant 0 : index
    %135 = vector.load %arg17[%c0_51, %c0_52] : memref<128x128xbf16, #tpu.memory_space<vmem>>, vector<128x128xbf16>
    %cst_53 = arith.constant dense<0.000000e+00> : vector<8x128xf32>
    %136 = tpu.matmul %134, %135, %cst_53 {dimension_numbers = #tpu.dot_dimension_numbers<[1], [0], [0], [1], [0, 0, 1, 1], [], []>} : vector<8x128xbf16>, vector<128x128xbf16>, vector<8x128xf32> -> vector<8x128xf32>
    %c0_54 = arith.constant 0 : index
    %c0_55 = arith.constant 0 : index
    %137 = vector.load %arg18[%c0_54, %c0_55] : memref<1x128xf32, #tpu.memory_space<vmem>>, vector<1x128xf32>
    %138 = vector.broadcast %137 : vector<1x128xf32> to vector<8x128xf32>
    %139 = arith.addf %136, %138 : vector<8x128xf32>
    %c0_56 = arith.constant 0 : index
    %c0_57 = arith.constant 0 : index
    %140 = vector.load %arg36[%c0_56, %c0_57] : memref<8x128xf32, #tpu.memory_space<vmem>>, vector<8x128xf32>
    tpu.vector_store %arg36[%c0_56, %c0_57], %139 {strides = array<i32>} : memref<8x128xf32, #tpu.memory_space<vmem>>, vector<8x128xf32>,
    %141 = arith.truncf %139 : vector<8x128xf32> to vector<8x128xbf16>
    %c0_58 = arith.constant 0 : index
    %c0_59 = arith.constant 0 : index
    %142 = vector.load %arg19[%c0_58, %c0_59] : memref<128x128xbf16, #tpu.memory_space<vmem>>, vector<128x128xbf16>
    %cst_60 = arith.constant dense<0.000000e+00> : vector<8x128xf32>
    %143 = tpu.matmul %141, %142, %cst_60 {dimension_numbers = #tpu.dot_dimension_numbers<[1], [0], [0], [1], [0, 0, 1, 1], [], []>} : vector<8x128xbf16>, vector<128x128xbf16>, vector<8x128xf32> -> vector<8x128xf32>
    %c0_61 = arith.constant 0 : index
    %c0_62 = arith.constant 0 : index
    %144 = vector.load %arg20[%c0_61, %c0_62] : memref<1x128xf32, #tpu.memory_space<vmem>>, vector<1x128xf32>
    %145 = vector.broadcast %144 : vector<1x128xf32> to vector<8x128xf32>
    %146 = arith.addf %143, %145 : vector<8x128xf32>
    %147 = vector.broadcast %9 : vector<8x1xf32> to vector<8x128xf32>
    %148 = arith.mulf %146, %147 : vector<8x128xf32>
    %cst_63 = arith.constant dense<0.000000e+00> : vector<128xf32>
    %149 = vector.multi_reduction <add>, %148, %cst_63 [0] : vector<8x128xf32> to vector<128xf32>
    %150 = vector.shape_cast %149 : vector<128xf32> to vector<1x128xf32>
    %151 = vector.broadcast %4 : f32 to vector<1x128xf32>
    %152 = arith.mulf %150, %151 : vector<1x128xf32>
    %153 = arith.mulf %146, %146 : vector<8x128xf32>
    %154 = vector.broadcast %9 : vector<8x1xf32> to vector<8x128xf32>
    %155 = arith.mulf %153, %154 : vector<8x128xf32>
    %cst_64 = arith.constant dense<0.000000e+00> : vector<128xf32>
    %156 = vector.multi_reduction <add>, %155, %cst_64 [0] : vector<8x128xf32> to vector<128xf32>
    %157 = vector.shape_cast %156 : vector<128xf32> to vector<1x128xf32>
    %158 = vector.broadcast %4 : f32 to vector<1x128xf32>
    %159 = arith.mulf %157, %158 : vector<1x128xf32>
    %160 = arith.mulf %152, %152 : vector<1x128xf32>
    %161 = arith.subf %159, %160 : vector<1x128xf32>
    %cst_65 = arith.constant 0.000000e+00 : f32
    %162 = vector.broadcast %cst_65 : f32 to vector<1x128xf32>
    %163 = arith.maximumf %161, %162 : vector<1x128xf32>
    %c0_66 = arith.constant 0 : index
    %c0_67 = arith.constant 0 : index
    %164 = vector.load %arg21[%c0_66, %c0_67] : memref<1x128xf32, #tpu.memory_space<vmem>>, vector<1x128xf32>
    %cst_68 = arith.constant 9.99999974E-6 : f32
    %165 = vector.broadcast %cst_68 : f32 to vector<1x128xf32>
    %166 = arith.addf %163, %165 : vector<1x128xf32>
    %167 = math.rsqrt %166 : vector<1x128xf32>
    %168 = arith.mulf %164, %167 : vector<1x128xf32>
    %c0_69 = arith.constant 0 : index
    %c0_70 = arith.constant 0 : index
    %169 = vector.load %arg22[%c0_69, %c0_70] : memref<1x128xf32, #tpu.memory_space<vmem>>, vector<1x128xf32>
    %170 = arith.mulf %152, %168 : vector<1x128xf32>
    %171 = arith.subf %169, %170 : vector<1x128xf32>
    %172 = vector.broadcast %168 : vector<1x128xf32> to vector<8x128xf32>
    %173 = arith.mulf %146, %172 : vector<8x128xf32>
    %174 = vector.broadcast %171 : vector<1x128xf32> to vector<8x128xf32>
    %175 = arith.addf %173, %174 : vector<8x128xf32>
    %cst_71 = arith.constant 0.000000e+00 : f32
    %176 = vector.broadcast %cst_71 : f32 to vector<8x128xf32>
    %177 = arith.cmpf oge, %175, %176 : vector<8x128xf32>
    %c0_72 = arith.constant 0 : index
    %c0_73 = arith.constant 0 : index
    %178 = vector.load %arg23[%c0_72, %c0_73] : memref<1x128xf32, #tpu.memory_space<vmem>>, vector<1x128xf32>
    %179 = vector.broadcast %178 : vector<1x128xf32> to vector<8x128xf32>
    %180 = arith.mulf %179, %175 : vector<8x128xf32>
    %181 = arith.select %177, %175, %180 : vector<8x128xi1>, vector<8x128xf32>
    %182 = arith.truncf %181 : vector<8x128xf32> to vector<8x128xbf16>
    %c0_74 = arith.constant 0 : index
    %c0_75 = arith.constant 0 : index
    %183 = vector.load %arg24[%c0_74, %c0_75] : memref<128x128xbf16, #tpu.memory_space<vmem>>, vector<128x128xbf16>
    %cst_76 = arith.constant dense<0.000000e+00> : vector<8x128xf32>
    %184 = tpu.matmul %182, %183, %cst_76 {dimension_numbers = #tpu.dot_dimension_numbers<[1], [0], [0], [1], [0, 0, 1, 1], [], []>} : vector<8x128xbf16>, vector<128x128xbf16>, vector<8x128xf32> -> vector<8x128xf32>
    %c0_77 = arith.constant 0 : index
    %c0_78 = arith.constant 0 : index
    %185 = vector.load %arg25[%c0_77, %c0_78] : memref<1x128xf32, #tpu.memory_space<vmem>>, vector<1x128xf32>
    %186 = vector.broadcast %185 : vector<1x128xf32> to vector<8x128xf32>
    %187 = arith.addf %184, %186 : vector<8x128xf32>
    %188 = vector.broadcast %9 : vector<8x1xf32> to vector<8x128xf32>
    %189 = arith.mulf %187, %188 : vector<8x128xf32>
    %cst_79 = arith.constant dense<0.000000e+00> : vector<128xf32>
    %190 = vector.multi_reduction <add>, %189, %cst_79 [0] : vector<8x128xf32> to vector<128xf32>
    %191 = vector.shape_cast %190 : vector<128xf32> to vector<1x128xf32>
    %192 = vector.broadcast %4 : f32 to vector<1x128xf32>
    %193 = arith.mulf %191, %192 : vector<1x128xf32>
    %194 = arith.mulf %187, %187 : vector<8x128xf32>
    %195 = vector.broadcast %9 : vector<8x1xf32> to vector<8x128xf32>
    %196 = arith.mulf %194, %195 : vector<8x128xf32>
    %cst_80 = arith.constant dense<0.000000e+00> : vector<128xf32>
    %197 = vector.multi_reduction <add>, %196, %cst_80 [0] : vector<8x128xf32> to vector<128xf32>
    %198 = vector.shape_cast %197 : vector<128xf32> to vector<1x128xf32>
    %199 = vector.broadcast %4 : f32 to vector<1x128xf32>
    %200 = arith.mulf %198, %199 : vector<1x128xf32>
    %201 = arith.mulf %193, %193 : vector<1x128xf32>
    %202 = arith.subf %200, %201 : vector<1x128xf32>
    %cst_81 = arith.constant 0.000000e+00 : f32
    %203 = vector.broadcast %cst_81 : f32 to vector<1x128xf32>
    %204 = arith.maximumf %202, %203 : vector<1x128xf32>
    %c0_82 = arith.constant 0 : index
    %c0_83 = arith.constant 0 : index
    %205 = vector.load %arg26[%c0_82, %c0_83] : memref<1x128xf32, #tpu.memory_space<vmem>>, vector<1x128xf32>
    %cst_84 = arith.constant 9.99999974E-6 : f32
    %206 = vector.broadcast %cst_84 : f32 to vector<1x128xf32>
    %207 = arith.addf %204, %206 : vector<1x128xf32>
    %208 = math.rsqrt %207 : vector<1x128xf32>
    %209 = arith.mulf %205, %208 : vector<1x128xf32>
    %c0_85 = arith.constant 0 : index
    %c0_86 = arith.constant 0 : index
    %210 = vector.load %arg27[%c0_85, %c0_86] : memref<1x128xf32, #tpu.memory_space<vmem>>, vector<1x128xf32>
    %211 = arith.mulf %193, %209 : vector<1x128xf32>
    %212 = arith.subf %210, %211 : vector<1x128xf32>
    %213 = vector.broadcast %209 : vector<1x128xf32> to vector<8x128xf32>
    %214 = arith.mulf %187, %213 : vector<8x128xf32>
    %215 = vector.broadcast %212 : vector<1x128xf32> to vector<8x128xf32>
    %216 = arith.addf %214, %215 : vector<8x128xf32>
    %cst_87 = arith.constant 0.000000e+00 : f32
    %217 = vector.broadcast %cst_87 : f32 to vector<8x128xf32>
    %218 = arith.cmpf oge, %216, %217 : vector<8x128xf32>
    %c0_88 = arith.constant 0 : index
    %c0_89 = arith.constant 0 : index
    %219 = vector.load %arg28[%c0_88, %c0_89] : memref<1x128xf32, #tpu.memory_space<vmem>>, vector<1x128xf32>
    %220 = vector.broadcast %219 : vector<1x128xf32> to vector<8x128xf32>
    %221 = arith.mulf %220, %216 : vector<8x128xf32>
    %222 = arith.select %218, %216, %221 : vector<8x128xi1>, vector<8x128xf32>
    %223 = arith.truncf %222 : vector<8x128xf32> to vector<8x128xbf16>
    %c0_90 = arith.constant 0 : index
    %c0_91 = arith.constant 0 : index
    %224 = vector.load %arg29[%c0_90, %c0_91] : memref<128x128xbf16, #tpu.memory_space<vmem>>, vector<128x128xbf16>
    %cst_92 = arith.constant dense<0.000000e+00> : vector<8x128xf32>
    %225 = tpu.matmul %223, %224, %cst_92 {dimension_numbers = #tpu.dot_dimension_numbers<[1], [0], [0], [1], [0, 0, 1, 1], [], []>} : vector<8x128xbf16>, vector<128x128xbf16>, vector<8x128xf32> -> vector<8x128xf32>
    %c0_93 = arith.constant 0 : index
    %c0_94 = arith.constant 0 : index
    %226 = vector.load %arg30[%c0_93, %c0_94] : memref<1x128xf32, #tpu.memory_space<vmem>>, vector<1x128xf32>
    %227 = vector.broadcast %226 : vector<1x128xf32> to vector<8x128xf32>
    %228 = arith.addf %225, %227 : vector<8x128xf32>
    %229 = vector.broadcast %9 : vector<8x1xf32> to vector<8x128xf32>
    %230 = arith.mulf %228, %229 : vector<8x128xf32>
    %cst_95 = arith.constant dense<0.000000e+00> : vector<128xf32>
    %231 = vector.multi_reduction <add>, %230, %cst_95 [0] : vector<8x128xf32> to vector<128xf32>
    %232 = vector.shape_cast %231 : vector<128xf32> to vector<1x128xf32>
    %233 = vector.broadcast %4 : f32 to vector<1x128xf32>
    %234 = arith.mulf %232, %233 : vector<1x128xf32>
    %235 = arith.mulf %228, %228 : vector<8x128xf32>
    %236 = vector.broadcast %9 : vector<8x1xf32> to vector<8x128xf32>
    %237 = arith.mulf %235, %236 : vector<8x128xf32>
    %cst_96 = arith.constant dense<0.000000e+00> : vector<128xf32>
    %238 = vector.multi_reduction <add>, %237, %cst_96 [0] : vector<8x128xf32> to vector<128xf32>
    %239 = vector.shape_cast %238 : vector<128xf32> to vector<1x128xf32>
    %240 = vector.broadcast %4 : f32 to vector<1x128xf32>
    %241 = arith.mulf %239, %240 : vector<1x128xf32>
    %242 = arith.mulf %234, %234 : vector<1x128xf32>
    %243 = arith.subf %241, %242 : vector<1x128xf32>
    %cst_97 = arith.constant 0.000000e+00 : f32
    %244 = vector.broadcast %cst_97 : f32 to vector<1x128xf32>
    %245 = arith.maximumf %243, %244 : vector<1x128xf32>
    %c0_98 = arith.constant 0 : index
    %c0_99 = arith.constant 0 : index
    %246 = vector.load %arg31[%c0_98, %c0_99] : memref<1x128xf32, #tpu.memory_space<vmem>>, vector<1x128xf32>
    %cst_100 = arith.constant 9.99999974E-6 : f32
    %247 = vector.broadcast %cst_100 : f32 to vector<1x128xf32>
    %248 = arith.addf %245, %247 : vector<1x128xf32>
    %249 = math.rsqrt %248 : vector<1x128xf32>
    %250 = arith.mulf %246, %249 : vector<1x128xf32>
    %c0_101 = arith.constant 0 : index
    %c0_102 = arith.constant 0 : index
    %251 = vector.load %arg32[%c0_101, %c0_102] : memref<1x128xf32, #tpu.memory_space<vmem>>, vector<1x128xf32>
    %252 = arith.mulf %234, %250 : vector<1x128xf32>
    %253 = arith.subf %251, %252 : vector<1x128xf32>
    %254 = vector.broadcast %250 : vector<1x128xf32> to vector<8x128xf32>
    %255 = arith.mulf %228, %254 : vector<8x128xf32>
    %256 = vector.broadcast %253 : vector<1x128xf32> to vector<8x128xf32>
    %257 = arith.addf %255, %256 : vector<8x128xf32>
    %cst_103 = arith.constant 0.000000e+00 : f32
    %258 = vector.broadcast %cst_103 : f32 to vector<8x128xf32>
    %259 = arith.cmpf oge, %257, %258 : vector<8x128xf32>
    %c0_104 = arith.constant 0 : index
    %c0_105 = arith.constant 0 : index
    %260 = vector.load %arg33[%c0_104, %c0_105] : memref<1x128xf32, #tpu.memory_space<vmem>>, vector<1x128xf32>
    %261 = vector.broadcast %260 : vector<1x128xf32> to vector<8x128xf32>
    %262 = arith.mulf %261, %257 : vector<8x128xf32>
    %263 = arith.select %259, %257, %262 : vector<8x128xi1>, vector<8x128xf32>
    %264 = arith.truncf %263 : vector<8x128xf32> to vector<8x128xbf16>
    %c0_106 = arith.constant 0 : index
    %c0_107 = arith.constant 0 : index
    %265 = vector.load %arg34[%c0_106, %c0_107] : memref<128x128xbf16, #tpu.memory_space<vmem>>, vector<128x128xbf16>
    %cst_108 = arith.constant dense<0.000000e+00> : vector<8x128xf32>
    %266 = tpu.matmul %264, %265, %cst_108 {dimension_numbers = #tpu.dot_dimension_numbers<[1], [0], [0], [1], [0, 0, 1, 1], [], []>} : vector<8x128xbf16>, vector<128x128xbf16>, vector<8x128xf32> -> vector<8x128xf32>
    %c0_109 = arith.constant 0 : index
    %c0_110 = arith.constant 0 : index
    %267 = vector.load %arg35[%c0_109, %c0_110] : memref<1x128xf32, #tpu.memory_space<vmem>>, vector<1x128xf32>
    %268 = vector.broadcast %267 : vector<1x128xf32> to vector<8x128xf32>
    %269 = arith.addf %266, %268 : vector<8x128xf32>
    %270 = tpu.iota {dimensions = array<i32: 1>} : vector<1x128xi32>
    %cst_111 = arith.constant 0.000000e+00 : f32
    %271 = vector.broadcast %cst_111 : f32 to vector<8x128xf32>
    %c2_i32 = arith.constant 2 : i32
    %272 = vector.broadcast %c2_i32 : i32 to vector<1x128xi32>
    %273 = arith.cmpi sge, %270, %272 : vector<1x128xi32>
    %c7_i32 = arith.constant 7 : i32
    %274 = vector.broadcast %c7_i32 : i32 to vector<1x128xi32>
    %275 = arith.cmpi slt, %270, %274 : vector<1x128xi32>
    %276 = arith.andi %273, %275 : vector<1x128xi1>
    %cst_112 = arith.constant 0xFF800000 : f32
    %277 = vector.shape_cast %276 : vector<1x128xi1> to vector<1x128xi1>
    %278 = vector.broadcast %277 : vector<1x128xi1> to vector<8x128xi1>
    %279 = vector.broadcast %cst_112 : f32 to vector<8x128xf32>
    %280 = arith.select %278, %269, %279 : vector<8x128xi1>, vector<8x128xf32>
    %cst_113 = arith.constant dense<0xFF800000> : vector<8xf32>
    %281 = vector.multi_reduction <maximumf>, %280, %cst_113 [1] : vector<8x128xf32> to vector<8xf32>
    %282 = vector.shape_cast %281 : vector<8xf32> to vector<8x1xf32>
    %283 = vector.broadcast %282 : vector<8x1xf32> to vector<8x128xf32>
    %284 = arith.subf %269, %283 : vector<8x128xf32>
    %cst_114 = arith.constant 0xFF800000 : f32
    %285 = vector.shape_cast %276 : vector<1x128xi1> to vector<1x128xi1>
    %286 = vector.broadcast %285 : vector<1x128xi1> to vector<8x128xi1>
    %287 = vector.broadcast %cst_114 : f32 to vector<8x128xf32>
    %288 = arith.select %286, %284, %287 : vector<8x128xi1>, vector<8x128xf32>
    %289 = math.exp %288 : vector<8x128xf32>
    %cst_115 = arith.constant dense<0.000000e+00> : vector<8xf32>
    %290 = vector.multi_reduction <add>, %289, %cst_115 [1] : vector<8x128xf32> to vector<8xf32>
    %291 = vector.shape_cast %290 : vector<8xf32> to vector<8x1xf32>
    %292 = math.log %291 : vector<8x1xf32>
    %293 = arith.addf %292, %282 : vector<8x1xf32>
    %294 = vector.shape_cast %276 : vector<1x128xi1> to vector<1x128xi1>
    %295 = vector.broadcast %294 : vector<1x128xi1> to vector<8x128xi1>
    %296 = vector.shape_cast %293 : vector<8x1xf32> to vector<8x1xf32>
    %297 = vector.broadcast %296 : vector<8x1xf32> to vector<8x128xf32>
    %298 = arith.select %295, %297, %271 : vector<8x128xi1>, vector<8x128xf32>
    %c7_i32_116 = arith.constant 7 : i32
    %299 = vector.broadcast %c7_i32_116 : i32 to vector<1x128xi32>
    %300 = arith.cmpi sge, %270, %299 : vector<1x128xi32>
    %c14_i32 = arith.constant 14 : i32
    %301 = vector.broadcast %c14_i32 : i32 to vector<1x128xi32>
    %302 = arith.cmpi slt, %270, %301 : vector<1x128xi32>
    %303 = arith.andi %300, %302 : vector<1x128xi1>
    %cst_117 = arith.constant 0xFF800000 : f32
    %304 = vector.shape_cast %303 : vector<1x128xi1> to vector<1x128xi1>
    %305 = vector.broadcast %304 : vector<1x128xi1> to vector<8x128xi1>
    %306 = vector.broadcast %cst_117 : f32 to vector<8x128xf32>
    %307 = arith.select %305, %269, %306 : vector<8x128xi1>, vector<8x128xf32>
    %cst_118 = arith.constant dense<0xFF800000> : vector<8xf32>
    %308 = vector.multi_reduction <maximumf>, %307, %cst_118 [1] : vector<8x128xf32> to vector<8xf32>
    %309 = vector.shape_cast %308 : vector<8xf32> to vector<8x1xf32>
    %310 = vector.broadcast %309 : vector<8x1xf32> to vector<8x128xf32>
    %311 = arith.subf %269, %310 : vector<8x128xf32>
    %cst_119 = arith.constant 0xFF800000 : f32
    %312 = vector.shape_cast %303 : vector<1x128xi1> to vector<1x128xi1>
    %313 = vector.broadcast %312 : vector<1x128xi1> to vector<8x128xi1>
    %314 = vector.broadcast %cst_119 : f32 to vector<8x128xf32>
    %315 = arith.select %313, %311, %314 : vector<8x128xi1>, vector<8x128xf32>
    %316 = math.exp %315 : vector<8x128xf32>
    %cst_120 = arith.constant dense<0.000000e+00> : vector<8xf32>
    %317 = vector.multi_reduction <add>, %316, %cst_120 [1] : vector<8x128xf32> to vector<8xf32>
    %318 = vector.shape_cast %317 : vector<8xf32> to vector<8x1xf32>
    %319 = math.log %318 : vector<8x1xf32>
    %320 = arith.addf %319, %309 : vector<8x1xf32>
    %321 = vector.shape_cast %303 : vector<1x128xi1> to vector<1x128xi1>
    %322 = vector.broadcast %321 : vector<1x128xi1> to vector<8x128xi1>
    %323 = vector.shape_cast %320 : vector<8x1xf32> to vector<8x1xf32>
    %324 = vector.broadcast %323 : vector<8x1xf32> to vector<8x128xf32>
    %325 = arith.select %322, %324, %298 : vector<8x128xi1>, vector<8x128xf32>
    %326 = arith.subf %269, %325 : vector<8x128xf32>
    %c0_121 = arith.constant 0 : index
    %c0_122 = arith.constant 0 : index
    %327 = vector.load %arg37[%c0_121, %c0_122] : memref<8x128xf32, #tpu.memory_space<vmem>>, vector<8x128xf32>
    tpu.vector_store %arg37[%c0_121, %c0_122], %326 {strides = array<i32>} : memref<8x128xf32, #tpu.memory_space<vmem>>, vector<8x128xf32>,
    return
  }
  func.func @transform_0(%arg0: i32) -> (i32, i32) {
    %c0_i32 = arith.constant 0 : i32
    %c0_i32_0 = arith.constant 0 : i32
    return %arg0, %c0_i32 : i32, i32
  }
  func.func @transform_1(%arg0: i32) -> (i32, i32) {
    %c0_i32 = arith.constant 0 : i32
    %c0_i32_0 = arith.constant 0 : i32
    %c0_i32_1 = arith.constant 0 : i32
    return %c0_i32, %c0_i32_0 : i32, i32
  }
  func.func @transform_2(%arg0: i32) -> (i32, i32) {
    %c0_i32 = arith.constant 0 : i32
    %c0_i32_0 = arith.constant 0 : i32
    %c0_i32_1 = arith.constant 0 : i32
    return %c0_i32, %c0_i32_0 : i32, i32
  }
  func.func @transform_3(%arg0: i32) -> (i32, i32) {
    %c0_i32 = arith.constant 0 : i32
    %c0_i32_0 = arith.constant 0 : i32
    %c0_i32_1 = arith.constant 0 : i32
    return %c0_i32, %c0_i32_0 : i32, i32
  }
  func.func @transform_4(%arg0: i32) -> (i32, i32) {
    %c0_i32 = arith.constant 0 : i32
    %c0_i32_0 = arith.constant 0 : i32
    %c0_i32_1 = arith.constant 0 : i32
    return %c0_i32, %c0_i32_0 : i32, i32
  }
  func.func @transform_5(%arg0: i32) -> (i32, i32) {
    %c0_i32 = arith.constant 0 : i32
    %c0_i32_0 = arith.constant 0 : i32
    %c0_i32_1 = arith.constant 0 : i32
    return %c0_i32, %c0_i32_0 : i32, i32
  }
  func.func @transform_6(%arg0: i32) -> (i32, i32) {
    %c0_i32 = arith.constant 0 : i32
    %c0_i32_0 = arith.constant 0 : i32
    %c0_i32_1 = arith.constant 0 : i32
    return %c0_i32, %c0_i32_0 : i32, i32
  }
  func.func @transform_7(%arg0: i32) -> (i32, i32) {
    %c0_i32 = arith.constant 0 : i32
    %c0_i32_0 = arith.constant 0 : i32
    %c0_i32_1 = arith.constant 0 : i32
    return %c0_i32, %c0_i32_0 : i32, i32
  }
  func.func @transform_8(%arg0: i32) -> (i32, i32) {
    %c0_i32 = arith.constant 0 : i32
    %c0_i32_0 = arith.constant 0 : i32
    %c0_i32_1 = arith.constant 0 : i32
    return %c0_i32, %c0_i32_0 : i32, i32
  }
  func.func @transform_9(%arg0: i32) -> (i32, i32) {
    %c0_i32 = arith.constant 0 : i32
    %c0_i32_0 = arith.constant 0 : i32
    %c0_i32_1 = arith.constant 0 : i32
    return %c0_i32, %c0_i32_0 : i32, i32
  }
  func.func @transform_10(%arg0: i32) -> (i32, i32) {
    %c0_i32 = arith.constant 0 : i32
    %c0_i32_0 = arith.constant 0 : i32
    %c0_i32_1 = arith.constant 0 : i32
    return %c0_i32, %c0_i32_0 : i32, i32
  }
  func.func @transform_11(%arg0: i32) -> (i32, i32) {
    %c0_i32 = arith.constant 0 : i32
    %c0_i32_0 = arith.constant 0 : i32
    %c0_i32_1 = arith.constant 0 : i32
    return %c0_i32, %c0_i32_0 : i32, i32
  }
  func.func @transform_12(%arg0: i32) -> (i32, i32) {
    %c0_i32 = arith.constant 0 : i32
    %c0_i32_0 = arith.constant 0 : i32
    %c0_i32_1 = arith.constant 0 : i32
    return %c0_i32, %c0_i32_0 : i32, i32
  }
  func.func @transform_13(%arg0: i32) -> (i32, i32) {
    %c0_i32 = arith.constant 0 : i32
    %c0_i32_0 = arith.constant 0 : i32
    %c0_i32_1 = arith.constant 0 : i32
    return %c0_i32, %c0_i32_0 : i32, i32
  }
  func.func @transform_14(%arg0: i32) -> (i32, i32) {
    %c0_i32 = arith.constant 0 : i32
    %c0_i32_0 = arith.constant 0 : i32
    %c0_i32_1 = arith.constant 0 : i32
    return %c0_i32, %c0_i32_0 : i32, i32
  }
  func.func @transform_15(%arg0: i32) -> (i32, i32) {
    %c0_i32 = arith.constant 0 : i32
    %c0_i32_0 = arith.constant 0 : i32
    %c0_i32_1 = arith.constant 0 : i32
    return %c0_i32, %c0_i32_0 : i32, i32
  }
  func.func @transform_16(%arg0: i32) -> (i32, i32) {
    %c0_i32 = arith.constant 0 : i32
    %c0_i32_0 = arith.constant 0 : i32
    %c0_i32_1 = arith.constant 0 : i32
    return %c0_i32, %c0_i32_0 : i32, i32
  }
  func.func @transform_17(%arg0: i32) -> (i32, i32) {
    %c0_i32 = arith.constant 0 : i32
    %c0_i32_0 = arith.constant 0 : i32
    %c0_i32_1 = arith.constant 0 : i32
    return %c0_i32, %c0_i32_0 : i32, i32
  }
  func.func @transform_18(%arg0: i32) -> (i32, i32) {
    %c0_i32 = arith.constant 0 : i32
    %c0_i32_0 = arith.constant 0 : i32
    %c0_i32_1 = arith.constant 0 : i32
    return %c0_i32, %c0_i32_0 : i32, i32
  }
  func.func @transform_19(%arg0: i32) -> (i32, i32) {
    %c0_i32 = arith.constant 0 : i32
    %c0_i32_0 = arith.constant 0 : i32
    %c0_i32_1 = arith.constant 0 : i32
    return %c0_i32, %c0_i32_0 : i32, i32
  }
  func.func @transform_20(%arg0: i32) -> (i32, i32) {
    %c0_i32 = arith.constant 0 : i32
    %c0_i32_0 = arith.constant 0 : i32
    %c0_i32_1 = arith.constant 0 : i32
    return %c0_i32, %c0_i32_0 : i32, i32
  }
  func.func @transform_21(%arg0: i32) -> (i32, i32) {
    %c0_i32 = arith.constant 0 : i32
    %c0_i32_0 = arith.constant 0 : i32
    %c0_i32_1 = arith.constant 0 : i32
    return %c0_i32, %c0_i32_0 : i32, i32
  }
  func.func @transform_22(%arg0: i32) -> (i32, i32) {
    %c0_i32 = arith.constant 0 : i32
    %c0_i32_0 = arith.constant 0 : i32
    %c0_i32_1 = arith.constant 0 : i32
    return %c0_i32, %c0_i32_0 : i32, i32
  }
  func.func @transform_23(%arg0: i32) -> (i32, i32) {
    %c0_i32 = arith.constant 0 : i32
    %c0_i32_0 = arith.constant 0 : i32
    %c0_i32_1 = arith.constant 0 : i32
    return %c0_i32, %c0_i32_0 : i32, i32
  }
  func.func @transform_24(%arg0: i32) -> (i32, i32) {
    %c0_i32 = arith.constant 0 : i32
    %c0_i32_0 = arith.constant 0 : i32
    %c0_i32_1 = arith.constant 0 : i32
    return %c0_i32, %c0_i32_0 : i32, i32
  }
  func.func @transform_25(%arg0: i32) -> (i32, i32) {
    %c0_i32 = arith.constant 0 : i32
    %c0_i32_0 = arith.constant 0 : i32
    %c0_i32_1 = arith.constant 0 : i32
    return %c0_i32, %c0_i32_0 : i32, i32
  }
  func.func @transform_26(%arg0: i32) -> (i32, i32) {
    %c0_i32 = arith.constant 0 : i32
    %c0_i32_0 = arith.constant 0 : i32
    %c0_i32_1 = arith.constant 0 : i32
    return %c0_i32, %c0_i32_0 : i32, i32
  }
  func.func @transform_27(%arg0: i32) -> (i32, i32) {
    %c0_i32 = arith.constant 0 : i32
    %c0_i32_0 = arith.constant 0 : i32
    %c0_i32_1 = arith.constant 0 : i32
    return %c0_i32, %c0_i32_0 : i32, i32
  }
  func.func @transform_28(%arg0: i32) -> (i32, i32) {
    %c0_i32 = arith.constant 0 : i32
    %c0_i32_0 = arith.constant 0 : i32
    %c0_i32_1 = arith.constant 0 : i32
    return %c0_i32, %c0_i32_0 : i32, i32
  }
  func.func @transform_29(%arg0: i32) -> (i32, i32) {
    %c0_i32 = arith.constant 0 : i32
    %c0_i32_0 = arith.constant 0 : i32
    %c0_i32_1 = arith.constant 0 : i32
    return %c0_i32, %c0_i32_0 : i32, i32
  }
  func.func @transform_30(%arg0: i32) -> (i32, i32) {
    %c0_i32 = arith.constant 0 : i32
    %c0_i32_0 = arith.constant 0 : i32
    %c0_i32_1 = arith.constant 0 : i32
    return %c0_i32, %c0_i32_0 : i32, i32
  }
  func.func @transform_31(%arg0: i32) -> (i32, i32) {
    %c0_i32 = arith.constant 0 : i32
    %c0_i32_0 = arith.constant 0 : i32
    %c0_i32_1 = arith.constant 0 : i32
    return %c0_i32, %c0_i32_0 : i32, i32
  }
  func.func @transform_32(%arg0: i32) -> (i32, i32) {
    %c0_i32 = arith.constant 0 : i32
    %c0_i32_0 = arith.constant 0 : i32
    %c0_i32_1 = arith.constant 0 : i32
    return %c0_i32, %c0_i32_0 : i32, i32
  }
  func.func @transform_33(%arg0: i32) -> (i32, i32) {
    %c0_i32 = arith.constant 0 : i32
    %c0_i32_0 = arith.constant 0 : i32
    %c0_i32_1 = arith.constant 0 : i32
    return %c0_i32, %c0_i32_0 : i32, i32
  }
  func.func @transform_34(%arg0: i32) -> (i32, i32) {
    %c0_i32 = arith.constant 0 : i32
    %c0_i32_0 = arith.constant 0 : i32
    %c0_i32_1 = arith.constant 0 : i32
    return %c0_i32, %c0_i32_0 : i32, i32
  }
  func.func @transform_35(%arg0: i32) -> (i32, i32) {
    %c0_i32 = arith.constant 0 : i32
    %c0_i32_0 = arith.constant 0 : i32
    return %arg0, %c0_i32 : i32, i32
  }
  func.func @transform_36(%arg0: i32) -> (i32, i32) {
    %c0_i32 = arith.constant 0 : i32
    %c0_i32_0 = arith.constant 0 : i32
    return %arg0, %c0_i32 : i32, i32
  }
}

</mosaic_0001>

<bundles_post_ra>
// kernel: ae_forward.1
= control target key start
LH: loop header
LB: loop body
LE: loop exit
PB: predicated region body
PF: predicated region fallthrough
CT: control target
= control target key end

     0   :  { %s2069_s6 = smov 1   ;;  %s2070_s10 = smov 2   ;;  %s2497_s0 = inlined_call_operand.smem [shape: u32[37], index: -1, kind: input, shape index: {}] }
   0x1   :  { %s2122_s5 = sld [smem:[%s2497_s0]]   ;;  %s2071_s14 = smov 3  }
   0x2   :  { %s2127_s9 = sld [smem:[%s2497_s0 + %s2069_s6]]   ;;  %s2072_s18 = smov 4  }
   0x3   :  { %s2132_s13 = sld [smem:[%s2497_s0 + %s2070_s10]]   ;;  %s2073_s22 = smov 5  }
   0x4   :  { %s2137_s17 = sld [smem:[%s2497_s0 + %s2071_s14]]   ;;  %s2074_s26 = smov 6  }
   0x5   :  { %s2142_s21 = sld [smem:[%s2497_s0 + %s2072_s18]]   ;;  %s2075_s30 = smov 7  }
   0x6   :  { %s2147_s25 = sld [smem:[%s2497_s0 + %s2073_s22]]   ;;  %s2076_s4 = smov 8  }
   0x7   :  { %s2152_s29 = sld [smem:[%s2497_s0 + %s2074_s26]]   ;;  %s2077_s10 = smov 9  }
   0x8   :  { %s2157_s3 = sld [smem:[%s2497_s0 + %s2075_s30]]   ;;  %s2078_s15 = smov 10  }
   0x9   :  { %s2162_s8 = sld [smem:[%s2497_s0 + %s2076_s4]]   ;;  %s2079_s20 = smov 11  }
   0xa   :  { %s2167_s14 = sld [smem:[%s2497_s0 + %s2077_s10]]   ;;  %s2080_s26 = smov 12  }
   0xb   :  { %s2172_s19 = sld [smem:[%s2497_s0 + %s2078_s15]]   ;;  %s2081_s1 = smov 13  }
   0xc   :  { %s2177_s24 = sld [smem:[%s2497_s0 + %s2079_s20]]   ;;  %s2082_s7 = smov 14  }
   0xd   :  { %s2182_s30 = sld [smem:[%s2497_s0 + %s2080_s26]]   ;;  %s2083_s15 = smov 15  }
   0xe   :  { %s2187_s6 = sld [smem:[%s2497_s0 + %s2081_s1]]   ;;  %s2084_s22 = smov 16  }
   0xf   :  { %s2192_s12 = sld [smem:[%s2497_s0 + %s2082_s7]]   ;;  %s2085_s28 = smov 17  }
  0x10   :  { %s2197_s20 = sld [smem:[%s2497_s0 + %s2083_s15]]   ;;  %s2086_s7 = smov 18  }
  0x11   :  { %2499 = sst [smem:[#allocation15_spill]] %s2172_s19  ;;  %s2087_s15 = smov 19  }
  0x12   :  { %s2202_s27 = sld [smem:[%s2497_s0 + %s2084_s22]]   ;;  %s2088_s22 = smov 20  }
  0x13   :  { %2500 = sst [smem:[#allocation16_spill]] %s2182_s30 }
  0x14   :  { %2501 = sst [smem:[#allocation17_spill]] %s2187_s6 }
  0x15   :  { %2502 = sst [smem:[#allocation18_spill]] %s2192_s12 }
  0x16   :  { %2503 = sst [smem:[#allocation19_spill]] %s2197_s20 }
  0x17   :  { %s2207_s4 = sld [smem:[%s2497_s0 + %s2085_s28]]   ;;  %s2089_s28 = smov 21  }
  0x18   :  { %2504 = sst [smem:[#allocation20_spill]] %s2202_s27 }
  0x19   :  { %s2212_s12 = sld [smem:[%s2497_s0 + %s2086_s7]]   ;;  %s2090_s7 = smov 22  }
  0x1a   :  { %s2217_s20 = sld [smem:[%s2497_s0 + %s2087_s15]]   ;;  %s2091_s15 = smov 23  }
  0x1b   :  { %s2222_s6 = sld [smem:[%s2497_s0 + %s2088_s22]]   ;;  %s2092_s22 = smov 24  }
  0x1c   :  { %s2232_s30 = sld [smem:[%s2497_s0 + %s2090_s7]]   ;;  %s2094_s7 = smov 26  }
  0x1d   :  { %2505 = sst [smem:[#allocation21_spill]] %s2207_s4 }
  0x1e   :  { %s2227_s4 = sld [smem:[%s2497_s0 + %s2089_s28]]   ;;  %s2093_s28 = smov 25  }
  0x20   :  { %2506 = sst [smem:[#allocation22_spill]] %s2217_s20 }
  0x21   :  { %2507 = sst [smem:[#allocation23_spill]] %s2222_s6 }
  0x22   :  { %2509 = sst [smem:[#allocation25_spill]] %s2232_s30 }
  0x23   :  { %s2237_s20 = sld [smem:[%s2497_s0 + %s2091_s15]]   ;;  %s2095_s15 = smov 27  }
  0x24   :  { %2508 = sst [smem:[#allocation24_spill]] %s2227_s4 }
  0x25   :  { %s2242_s6 = sld [smem:[%s2497_s0 + %s2092_s22]]   ;;  %s2096_s22 = smov 28  }
  0x26   :  { %s2247_s4 = sld [smem:[%s2497_s0 + %s2093_s28]]   ;;  %s2097_s28 = smov 29  }
  0x27   :  { %s2252_s30 = sld [smem:[%s2497_s0 + %s2094_s7]]   ;;  %s2098_s7 = smov 30  }
  0x28   :  { %s2257_s27 = sld [smem:[%s2497_s0 + %s2095_s15]]   ;;  %s2099_s15 = smov 31  }
  0x2b   :  { %2510 = sst [smem:[#allocation26_spill]] %s2242_s6 }
  0x2c   :  { %2511 = sst [smem:[#allocation27_spill]] %s2247_s4 }
  0x2d   :  { %2512 = sst [smem:[#allocation28_spill]] %s2252_s30 }
  0x2e   :  { %2513 = sst [smem:[#allocation29_spill]] %s2257_s27 }
  0x2f   :  { %s2262_s6 = sld [smem:[%s2497_s0 + %s2096_s22]]   ;;  %s2100_s22 = smov 32  }
  0x30   :  { %s2267_s4 = sld [smem:[%s2497_s0 + %s2097_s28]]   ;;  %s2101_s28 = smov 33  }
  0x31   :  { %s2272_s30 = sld [smem:[%s2497_s0 + %s2098_s7]]   ;;  %s2102_s7 = smov 34  }
  0x32   :  { %s2277_s27 = sld [smem:[%s2497_s0 + %s2099_s15]]   ;;  %s2103_s15 = smov 35  }
  0x33   :  { %s2282_s19 = sld [smem:[%s2497_s0 + %s2100_s22]]   ;;  %s2104_s22 = smov 36  }
  0x36   :  { %2514 = sst [smem:[#allocation30_spill]] %s2267_s4 }
  0x37   :  { %2515 = sst [smem:[#allocation31_spill]] %s2272_s30 }
  0x38   :  { %2516 = sst [smem:[#allocation32_spill]] %s2277_s27 }
  0x39   :  { %2517 = sst [smem:[#allocation33_spill]] %s2282_s19 }
  0x3a   :  { %s2287_s4 = sld [smem:[%s2497_s0 + %s2101_s28]]  }
  0x3b   :  { %s2292_s30 = sld [smem:[%s2497_s0 + %s2102_s7]]  }
  0x3c   :  { %s2297_s27 = sld [smem:[%s2497_s0 + %s2103_s15]]  }
  0x3d   :  { %s2302_s19 = sld [smem:[%s2497_s0 + %s2104_s22]]  }
  0x3e   :  { %79 = vsyncpa [#allocation3], 0 }
  0x3f   :  { %80 = vsyncpa [#allocation6], 0 }
  0x40   :  { %81 = vsyncpa [#allocation9], 0 }
  0x41   :  { %82 = vsyncpa [#allocation4], 0  ;;  %s2105_s28 = smov [#allocation5]   ;;  %s2106_s2 = smov [#allocation2]  }
  0x42   :  { %s144_s1 = sshll.u32 %s2105_s28, 4  ;;  %s124_s7 = sshll.u32 %s2106_s2, 4  ;;  %s145_s1 = int_to_ptr.vmem [resolvable:$true] %s144_s1  ;;  %s125_s7 = int_to_ptr.vmem [resolvable:$true] %s124_s7 }
  0x43   :  { %s1969_s10 = scalar_lea.vmem %s145_s1, 1024  ;;  %p1974_p1 = scmp.lt.s32.totalorder %s145_s1, %s145_s1 }
  0x44   :  { %p1970_p0 = scmp.ne.s32.totalorder %s145_s1, %s1969_s10  ;;  %p1975_p2 = scmp.lt.s32.totalorder %s1969_s10, %s1969_s10 }
  0x46   :  { %p1976_p3 = por %p1975_p2, %p1974_p1 }
  0x48   :  { %p1977_p4 = pnand %p1976_p3, %p1970_p0 }
  0x4a   :  { %1980 = shalt.err (!%p1977_p4)
}
  0x4b   :  { %s2107_s11 = smov 64   ;;  %s2108_s0 = smov 4  }
  0x4c   :  { %150 = dma.hbm_to_vmem [thread:$0]  %s2237_s20, 1024, %s145_s1, [#allocation6], %s2107_s11, %s2107_s11, %s2108_s0  }
  0x4d   :  { %s1989_s15 = scalar_lea.vmem %s125_s7, 1024  ;;  %p1994_p6 = scmp.lt.s32.totalorder %s125_s7, %s125_s7 }
  0x4e   :  { %p1990_p5 = scmp.ne.s32.totalorder %s125_s7, %s1989_s15  ;;  %p1995_p7 = scmp.lt.s32.totalorder %s1989_s15, %s1989_s15 }
  0x50   :  { %p1996_p8 = por %p1995_p7, %p1994_p6 }
  0x52   :  { %p1997_p9 = pnand %p1996_p8, %p1990_p5 }
  0x54   :  { %2000 = shalt.err (!%p1997_p9)
}
  0x55   :  { %130 = dma.hbm_to_vmem [thread:$0]  %s2212_s12, 1024, %s125_s7, [#allocation3], %s2107_s11, %s2107_s11, %s2108_s0  }
  0x56   :  { %s2109_s16 = smov [#allocation7]   ;;  %s2110_s22 = smov [#allocation8]  }
  0x57   :  { %s164_s18 = sshll.u32 %s2109_s16, 4  ;;  %s184_s23 = sshll.u32 %s2110_s22, 4  ;;  %s165_s18 = int_to_ptr.vmem [resolvable:$true] %s164_s18  ;;  %s185_s23 = int_to_ptr.vmem [resolvable:$true] %s184_s23 }
  0x58   :  { %s2009_s26 = scalar_lea.vmem %s165_s18, 1024  ;;  %p2014_p11 = scmp.lt.s32.totalorder %s165_s18, %s165_s18 }
  0x59   :  { %p2010_p10 = scmp.ne.s32.totalorder %s165_s18, %s2009_s26  ;;  %p2015_p12 = scmp.lt.s32.totalorder %s2009_s26, %s2009_s26 }
  0x5b   :  { %p2016_p13 = por %p2015_p12, %p2014_p11 }
  0x5d   :  { %p2017_p0 = pnand %p2016_p13, %p2010_p10 }
  0x5f   :  { %2020 = shalt.err (!%p2017_p0)
}
  0x60   :  { %170 = dma.hbm_to_vmem [thread:$0]  %s2262_s6, 1024, %s165_s18, [#allocation6], %s2107_s11, %s2107_s11, %s2108_s0  }
  0x61   :  { %s2029_s20 = scalar_lea.vmem %s185_s23, 1024  ;;  %p2034_p2 = scmp.lt.s32.totalorder %s185_s23, %s185_s23 }
  0x62   :  { %p2030_p1 = scmp.ne.s32.totalorder %s185_s23, %s2029_s20  ;;  %p2035_p3 = scmp.lt.s32.totalorder %s2029_s20, %s2029_s20 }
  0x64   :  { %p2036_p4 = por %p2035_p3, %p2034_p2 }
  0x66   :  { %p2037_p5 = pnand %p2036_p4, %p2030_p1 }
  0x68   :  { %2040 = shalt.err (!%p2037_p5)
}
  0x69   :  { %190 = dma.hbm_to_vmem [thread:$0]  %s2287_s4, 1024, %s185_s23, [#allocation9], %s2107_s11, %s2107_s11, %s2108_s0  }
  0x6a   :  { %2061 = dma.done.wait [#allocation3], 1024  }
  0x6b   :  { %2062 = vsyncadd [#allocation3], 4294966272 }
  0x6c   :  { %2063 = dma.done.wait [#allocation6], 2048  }
  0x6d   :  { %2064 = vsyncadd [#allocation6], 4294965248 }
  0x6e   :  { %2065 = dma.done.wait [#allocation9], 1024  }
  0x6f   :  { %2066 = vsyncadd [#allocation9], 4294966272  ;;  %v2111_v0 = vmov 0.0   ;;  %vm2112_vm0 = vmmov 0   ;;  %v1877_v1 = vld [vmem:[%s2127_s9 + $0x38] sm:$0xff]   ;;  %v1878_v2 = vld [vmem:[%s2127_s9 + $0x30] sm:$0xff]   ;;  %v362_v44 = vlaneseq }
  0x70   :  { %1672 = vmatprep.subr.bf16.mxu0 %v2111_v0  ;;  %1688 = vmatprep.mubr.msk.bf16.mxu0 %vm2112_vm0, %v2111_v0  ;;  %v1879_v3 = vld [vmem:[%s2127_s9 + $0x28] sm:$0xff]   ;;  %v1880_v4 = vld [vmem:[%s2127_s9 + $0x20] sm:$0xff]   ;;  %v1881_v5 = vld [vmem:[%s2127_s9 + $0x18] sm:$0xff]   ;;  %s2529_s6 = sld [smem:[#allocation26_spill]] }
  0x71   :  { %1692 = vmatprep.subr.bf16.mxu1 %v2111_v0  ;;  %1708 = vmatprep.mubr.msk.bf16.mxu1 %vm2112_vm0, %v2111_v0  ;;  %v1882_v6 = vld [vmem:[%s2127_s9 + $0x10] sm:$0xff]   ;;  %v1883_v7 = vld [vmem:[%s2127_s9 + $0x8] sm:$0xff]   ;;  %v1884_v8 = vld [vmem:[%s2127_s9] sm:$0xff]   ;;  %v363_v45 = vshrl.u32 %v362_v44, 7  ;;  %s2519_s9 = sld [smem:[#allocation20_spill]] }
  0x72   :  { %1673 = vmatpush3.bf16.msra.mxu0 %v1877_v1  ;;  %v220_v9 = vld [vmem:[%s2122_s5] sm:$0xff]  ;;  %v1885_v11 = vld [vmem:[%s2152_s29 + $0x38] sm:$0xff]   ;;  %v1886_v12 = vld [vmem:[%s2152_s29 + $0x30] sm:$0xff]   ;;  %s2518_s5 = sld [smem:[#allocation15_spill]] }
  0x73   :  { %1674 = vmatprep.subr.bf16.mxu0 %v2111_v0  ;;  %v221_v10 = vpack.c.bf16 %v220_v9, %v220_v9  ;;  %1693 = vmatpush3.bf16.msra.mxu1 %v1885_v11  ;;  %v1887_v13 = vld [vmem:[%s2152_s29 + $0x28] sm:$0xff]   ;;  %v1888_v14 = vld [vmem:[%s2152_s29 + $0x20] sm:$0xff]   ;;  %v1889_v15 = vld [vmem:[%s2152_s29 + $0x18] sm:$0xff]   ;;  %v2364_v47 = vsub.s32 0, %v363_v45  ;;  %s2530_s12 = sld [smem:[#allocation27_spill]] }
  0x74   :  { %1694 = vmatprep.subr.bf16.mxu1 %v2111_v0  ;;  %v1890_v16 = vld [vmem:[%s2152_s29 + $0x10] sm:$0xff]   ;;  %v1891_v17 = vld [vmem:[%s2152_s29 + $0x8] sm:$0xff]   ;;  %v1892_v18 = vld [vmem:[%s2152_s29] sm:$0xff]   ;;  %s2524_s29 = sld [smem:[#allocation21_spill]] }
  0x75   :  { %v1522_v19 = vld [vmem:[%s2132_s13] ss:$0 sm:$0xff]  ;;  %v1893_v61 = vld [vmem:[%s2177_s24 + $0x38] sm:$0xff]   ;;  %v1894_v62 = vld [vmem:[%s2177_s24 + $0x30] sm:$0xff]   ;;  %s2520_s13 = sld [smem:[#allocation16_spill]] }
  0x76   :  { %1675 = vmatpush3.bf16.msra.mxu0 %v1878_v2  ;;  %v354_v46 = vld [vmem:[%s2137_s17] sm:$0x1]  ;;  %v1895_v63 = vld [vmem:[%s2177_s24 + $0x28] sm:$0xff]   ;;  %v1897_v2 = vld [vmem:[%s2177_s24 + $0x18] sm:$0xff]   ;;  %s2521_s17 = sld [smem:[#allocation17_spill]] }
  0x77   :  { %1676 = vmatprep.subr.bf16.mxu0 %v2111_v0  ;;  %1695 = vmatpush3.bf16.msra.mxu1 %v1886_v12  ;;  %v358_v50 = vld [vmem:[%s2142_s21] sm:$0x1]  ;;  %s2522_s21 = sld [smem:[#allocation18_spill]] }
  0x78   :  { %1696 = vmatprep.subr.bf16.mxu1 %v2111_v0  ;;  %v1531_v56 = vld [vmem:[%s2147_s25] ss:$0 sm:$0xff]  ;;  %s2523_s25 = sld [smem:[#allocation19_spill]] }
  0x79   :  { %v1896_v1 = vld [vmem:[%s2177_s24 + $0x20] sm:$0xff]   ;;  %s2531_s4 = sld [smem:[#allocation28_spill]] }
  0x7a   :  { %1677 = vmatpush3.bf16.msra.mxu0 %v1879_v3  ;;  %v1898_v3 = vld [vmem:[%s2177_s24 + $0x10] sm:$0xff]   ;;  %s2532_s28 = sld [smem:[#allocation29_spill]] }
  0x7b   :  { %1678 = vmatprep.subr.bf16.mxu0 %v2111_v0  ;;  %1697 = vmatpush3.bf16.msra.mxu1 %v1887_v13  ;;  %s2533_s1 = sld [smem:[#allocation30_spill]] }
  0x7c   :  { %1698 = vmatprep.subr.bf16.mxu1 %v2111_v0  ;;  %s2534_s2 = sld [smem:[#allocation31_spill]] }
  0x7d   :  { %s2535_s7 = sld [smem:[#allocation32_spill]] }
  0x7e   :  { %1679 = vmatpush3.bf16.msra.mxu0 %v1880_v4  ;;  %v1899_v4 = vld [vmem:[%s2177_s24 + $0x8] sm:$0xff]   ;;  %s2536_s10 = sld [smem:[#allocation33_spill]] }
  0x7f   :  { %1680 = vmatprep.subr.bf16.mxu0 %v2111_v0  ;;  %1699 = vmatpush3.bf16.msra.mxu1 %v1888_v14 }
  0x80   :  { %1700 = vmatprep.subr.bf16.mxu1 %v2111_v0 }
  0x82   :  { %1681 = vmatpush3.bf16.msra.mxu0 %v1881_v5  ;;  %v1900_v5 = vld [vmem:[%s2177_s24] sm:$0xff]   ;;  %s2528_s24 = sld [smem:[#allocation25_spill]] }
  0x83   :  { %1682 = vmatprep.subr.bf16.mxu0 %v2111_v0  ;;  %1701 = vmatpush3.bf16.msra.mxu1 %v1889_v15 }
  0x84   :  { %1702 = vmatprep.subr.bf16.mxu1 %v2111_v0 }
  0x86   :  { %1683 = vmatpush3.bf16.msra.mxu0 %v1882_v6  ;;  %v1532_v6 = vld [vmem:[%s2157_s3] ss:$0 sm:$0xff]  ;;  %s2525_s3 = sld [smem:[#allocation22_spill]] }
  0x87   :  { %1684 = vmatprep.subr.bf16.mxu0 %v2111_v0  ;;  %1703 = vmatpush3.bf16.msra.mxu1 %v1890_v16 }
  0x88   :  { %1704 = vmatprep.subr.bf16.mxu1 %v2111_v0 }
  0x8a   :  { %1685 = vmatpush3.bf16.msra.mxu0 %v1883_v7 }
  0x8b   :  { %1686 = vmatprep.subr.bf16.mxu0 %v2111_v0  ;;  %1705 = vmatpush3.bf16.msra.mxu1 %v1891_v17 }
  0x8c   :  { %1706 = vmatprep.subr.bf16.mxu1 %v2111_v0 }
  0x8e   :  { %1687 = vmatpush3.bf16.msra.mxu0 %v1884_v8 }
  0x8f   :  { %1712 = vmatprep.subr.bf16.mxu0 %v2111_v0  ;;  %1707 = vmatpush3.bf16.msra.mxu1 %v1892_v18 }
  0x90   :  { %1732 = vmatprep.subr.bf16.mxu1 %v2111_v0 }
  0x91   :  { %1689 = vmatmul.mubr.bf16.vlgmr.msra.gmra.mxu0 %v221_v10 }
  0x92   :  { %1728 = vmatprep.mubr.msk.bf16.mxu0 %vm2112_vm0, %v2111_v0  ;;  %1713 = vmatpush3.bf16.msra.mxu0 %v1893_v61  ;;  %v1915_v61 = vld [vmem:[#allocation2 + $0x8] sm:$0xff]  }
  0x93   :  { %1714 = vmatprep.subr.bf16.mxu0 %v2111_v0 }
  0x96   :  { %1715 = vmatpush3.bf16.msra.mxu0 %v1894_v62  ;;  %v1542_v62 = vld [vmem:[%s2520_s13] ss:$0 sm:$0xff] }
  0x97   :  { %1716 = vmatprep.subr.bf16.mxu0 %v2111_v0 }
  0x9a   :  { %1717 = vmatpush3.bf16.msra.mxu0 %v1895_v63 }
  0x9b   :  { %1718 = vmatprep.subr.bf16.mxu0 %v2111_v0 }
  0x9e   :  { %1719 = vmatpush3.bf16.msra.mxu0 %v1896_v1 }
  0x9f   :  { %1720 = vmatprep.subr.bf16.mxu0 %v2111_v0 }
  0xa2   :  { %1721 = vmatpush3.bf16.msra.mxu0 %v1897_v2 }
  0xa3   :  { %1722 = vmatprep.subr.bf16.mxu0 %v2111_v0 }
  0xa6   :  { %1723 = vmatpush3.bf16.msra.mxu0 %v1898_v3 }
  0xa7   :  { %1724 = vmatprep.subr.bf16.mxu0 %v2111_v0 }
  0xaa   :  { %1725 = vmatpush3.bf16.msra.mxu0 %v1899_v4 }
  0xab   :  { %1726 = vmatprep.subr.bf16.mxu0 %v2111_v0 }
  0xae   :  { %1727 = vmatpush3.bf16.msra.mxu0 %v1900_v5 }
  0xaf   :  { %1752 = vmatprep.subr.bf16.mxu0 %v2111_v0 }
 0x151   :  { %v327_v20 = vpop.f32.mrf.mxu0 }
 0x152   :  { %v328_v21 = vadd.f32 %v1522_v19, %v327_v20 }
 0x153   :  { %v1690_v22 = vpop.f32.mrf.mxu0 }
 0x154   :  { %v334_v23 = vrot.slane %v328_v21, 4  ;;  %v342_v24 = vmul.f32 %v328_v21, %v328_v21 }
 0x155   :  { %v330_v25 = vpop.f32.mrf.mxu0 }
 0x156   :  { %v335_v26 = vadd.f32 %v334_v23, %v328_v21  ;;  %v344_v27 = vrot.slane %v342_v24, 4 }
 0x157   :  { %v1691_v28 = vpop.f32.mrf.mxu0 }
 0x158   :  { %v336_v29 = vrot.slane %v335_v26, 2  ;;  %v345_v30 = vadd.f32 %v344_v27, %v342_v24 }
 0x15a   :  { %v337_v31 = vadd.f32 %v336_v29, %v335_v26  ;;  %v346_v32 = vrot.slane %v345_v30, 2 }
 0x15c   :  { %v338_v33 = vrot.slane %v337_v31, 1  ;;  %v347_v34 = vadd.f32 %v346_v32, %v345_v30 }
 0x15e   :  { %v339_v35 = vadd.f32 %v338_v33, %v337_v31  ;;  %v348_v36 = vrot.slane %v347_v34, 1  ;;  %v517_v31 = vld [vmem:[%s2162_s8] sm:$0x1]  ;;  %s2526_s8 = sld [smem:[#allocation23_spill]] }
 0x160   :  { %v341_v37 = vmul.f32 0.125, %v339_v35  ;;  %v349_v38 = vadd.f32 %v348_v36, %v347_v34  ;;  %v521_v34 = vld [vmem:[%s2167_s14] sm:$0x1]  ;;  %s2527_s14 = sld [smem:[#allocation24_spill]] }
 0x162   :  { %v350_v39 = vmul.f32 0.125, %v349_v38  ;;  %v351_v40 = vmul.f32 %v341_v37, %v341_v37 }
 0x164   :  { %v352_v41 = vsub.f32 %v350_v39, %v351_v40  ;;  %v1541_v40 = vld [vmem:[%s2518_s5] ss:$0 sm:$0xff] }
 0x166   :  { %v353_v42 = vmax.f32 %v352_v41, 0.0 }
 0x168   :  { %v355_v43 = vadd.f32 1e-05, %v353_v42 }
 0x16a   :  { %1941 = vrsqrt.f32 %v355_v43 }
 0x177   :  { %v1942_v48 = vpop.eup %1941 }
 0x178   :  { %v357_v49 = vmul.f32 %v1942_v48, %v354_v46  ;;  %v1901_v46 = vld [vmem:[%s2519_s9 + $0x38] sm:$0xff]   ;;  %v1902_v48 = vld [vmem:[%s2519_s9 + $0x30] sm:$0xff]  }
 0x17a   :  { %v359_v51 = vmul.f32 %v357_v49, %v341_v37  ;;  %v365_v52 = vrot.slane %v357_v49, %v2364_v47  ;;  %v1903_v49 = vld [vmem:[%s2519_s9 + $0x28] sm:$0xff]  }
 0x17c   :  { %v360_v53 = vsub.f32 %v358_v50, %v359_v51  ;;  %v367_v54 = vmul.f32 %v365_v52, %v328_v21  ;;  %v1904_v50 = vld [vmem:[%s2519_s9 + $0x20] sm:$0xff]   ;;  %v1905_v51 = vld [vmem:[%s2519_s9 + $0x18] sm:$0xff]   ;;  %v1906_v52 = vld [vmem:[%s2519_s9 + $0x10] sm:$0xff]  }
 0x17e   :  { %v372_v55 = vrot.slane %v360_v53, %v2364_v47  ;;  %v1907_v53 = vld [vmem:[%s2519_s9 + $0x8] sm:$0xff]  }
 0x180   :  { %v374_v57 = vadd.f32 %v372_v55, %v367_v54  ;;  %v1908_v54 = vld [vmem:[%s2519_s9] sm:$0xff]   ;;  %v1909_v55 = vld [vmem:[#allocation2 + $0x38] sm:$0xff]  }
 0x182   :  { %vm375_vm1 = vcmp.ge.f32.partialorder %v374_v57, 0.0  ;;  %v383_v58 = vmul.f32 %v1531_v56, %v374_v57  ;;  %v1910_v56 = vld [vmem:[#allocation2 + $0x30] sm:$0xff]  }
 0x184   :  { %v384_v59 = vsel %vm375_vm1, %v374_v57, %v383_v58  ;;  %v1911_v57 = vld [vmem:[#allocation2 + $0x28] sm:$0xff]   ;;  %v1912_v58 = vld [vmem:[#allocation2 + $0x20] sm:$0xff]  }
 0x185   :  { %v385_v60 = vpack.c.bf16 %v384_v59, %v384_v59  ;;  %v1913_v59 = vld [vmem:[#allocation2 + $0x18] sm:$0xff]  }
 0x187   :  { %1709 = vmatmul.mubr.bf16.vlgmr.msra.gmra.mxu1 %v385_v60  ;;  %v1914_v60 = vld [vmem:[#allocation2 + $0x10] sm:$0xff]  }
 0x188   :  { %1748 = vmatprep.mubr.msk.bf16.mxu1 %vm2112_vm0, %v2111_v0  ;;  %1733 = vmatpush3.bf16.msra.mxu1 %v1901_v46 }
 0x189   :  { %1734 = vmatprep.subr.bf16.mxu1 %v2111_v0 }
 0x18c   :  { %1735 = vmatpush3.bf16.msra.mxu1 %v1902_v48  ;;  %v1917_v48 = vld [vmem:[#allocation5 + $0x38] sm:$0xff]  }
 0x18d   :  { %1736 = vmatprep.subr.bf16.mxu1 %v2111_v0 }
 0x190   :  { %1737 = vmatpush3.bf16.msra.mxu1 %v1903_v49  ;;  %v1918_v49 = vld [vmem:[#allocation5 + $0x30] sm:$0xff]  }
 0x191   :  { %1738 = vmatprep.subr.bf16.mxu1 %v2111_v0 }
 0x194   :  { %1739 = vmatpush3.bf16.msra.mxu1 %v1904_v50  ;;  %v1919_v50 = vld [vmem:[#allocation5 + $0x28] sm:$0xff]  }
 0x195   :  { %1740 = vmatprep.subr.bf16.mxu1 %v2111_v0 }
 0x198   :  { %1741 = vmatpush3.bf16.msra.mxu1 %v1905_v51  ;;  %v1920_v51 = vld [vmem:[#allocation5 + $0x20] sm:$0xff]  }
 0x199   :  { %1742 = vmatprep.subr.bf16.mxu1 %v2111_v0 }
 0x19c   :  { %1743 = vmatpush3.bf16.msra.mxu1 %v1906_v52  ;;  %v1921_v52 = vld [vmem:[#allocation5 + $0x18] sm:$0xff]  }
 0x19d   :  { %1744 = vmatprep.subr.bf16.mxu1 %v2111_v0 }
 0x1a0   :  { %1745 = vmatpush3.bf16.msra.mxu1 %v1907_v53  ;;  %v1922_v53 = vld [vmem:[#allocation5 + $0x10] sm:$0xff]  }
 0x1a1   :  { %1746 = vmatprep.subr.bf16.mxu1 %v2111_v0 }
 0x1a4   :  { %1747 = vmatpush3.bf16.msra.mxu1 %v1908_v54  ;;  %v1923_v54 = vld [vmem:[#allocation5 + $0x8] sm:$0xff]  }
 0x1a5   :  { %1772 = vmatprep.subr.bf16.mxu1 %v2111_v0 }
 0x247   :  { %v491_v7 = vpop.f32.mrf.mxu1 }
 0x248   :  { %v492_v8 = vadd.f32 %v1532_v6, %v491_v7 }
 0x249   :  { %v1710_v9 = vpop.f32.mrf.mxu1 }
 0x24a   :  { %v498_v10 = vrot.slane %v492_v8, 4  ;;  %v505_v11 = vmul.f32 %v492_v8, %v492_v8 }
 0x24b   :  { %v494_v12 = vpop.f32.mrf.mxu1 }
 0x24c   :  { %v499_v13 = vadd.f32 %v498_v10, %v492_v8  ;;  %v507_v14 = vrot.slane %v505_v11, 4 }
 0x24d   :  { %v1711_v15 = vpop.f32.mrf.mxu1 }
 0x24e   :  { %v500_v16 = vrot.slane %v499_v13, 2  ;;  %v508_v17 = vadd.f32 %v507_v14, %v505_v11 }
 0x250   :  { %v501_v18 = vadd.f32 %v500_v16, %v499_v13  ;;  %v509_v19 = vrot.slane %v508_v17, 2 }
 0x252   :  { %v502_v20 = vrot.slane %v501_v18, 1  ;;  %v510_v21 = vadd.f32 %v509_v19, %v508_v17 }
 0x254   :  { %v503_v22 = vadd.f32 %v502_v20, %v501_v18  ;;  %v511_v23 = vrot.slane %v510_v21, 1 }
 0x256   :  { %v504_v24 = vmul.f32 0.125, %v503_v22  ;;  %v512_v25 = vadd.f32 %v511_v23, %v510_v21 }
 0x258   :  { %v513_v26 = vmul.f32 0.125, %v512_v25  ;;  %v514_v27 = vmul.f32 %v504_v24, %v504_v24 }
 0x25a   :  { %v515_v28 = vsub.f32 %v513_v26, %v514_v27  ;;  %v684_v27 = vld [vmem:[%s2522_s21] sm:$0x1] }
 0x25c   :  { %v516_v29 = vmax.f32 %v515_v28, 0.0 }
 0x25e   :  { %v518_v30 = vadd.f32 1e-05, %v516_v29 }
 0x260   :  { %1943 = vrsqrt.f32 %v518_v30 }
 0x26d   :  { %v1944_v32 = vpop.eup %1943 }
 0x26e   :  { %v520_v33 = vmul.f32 %v1944_v32, %v517_v31 }
 0x270   :  { %v522_v35 = vmul.f32 %v520_v33, %v504_v24  ;;  %v528_v36 = vrot.slane %v520_v33, %v2364_v47  ;;  %v680_v24 = vld [vmem:[%s2521_s17] sm:$0x1] }
 0x271   :  { %v1551_v33 = vld [vmem:[%s2523_s25] ss:$0 sm:$0xff] }
 0x272   :  { %v523_v37 = vsub.f32 %v521_v34, %v522_v35  ;;  %v530_v38 = vmul.f32 %v528_v36, %v492_v8 }
 0x274   :  { %v535_v39 = vrot.slane %v523_v37, %v2364_v47 }
 0x276   :  { %v537_v41 = vadd.f32 %v535_v39, %v530_v38  ;;  %v1916_v38 = vld [vmem:[#allocation2] sm:$0xff]  }
 0x277   :  { %v1552_v39 = vld [vmem:[%s2524_s29] ss:$0 sm:$0xff] }
 0x278   :  { %vm538_vm2 = vcmp.ge.f32.partialorder %v537_v41, 0.0  ;;  %v546_v42 = vmul.f32 %v1541_v40, %v537_v41 }
 0x27a   :  { %v547_v43 = vsel %vm538_vm2, %v537_v41, %v546_v42 }
 0x27b   :  { %v548_v45 = vpack.c.bf16 %v547_v43, %v547_v43 }
 0x27d   :  { %1729 = vmatmul.mubr.bf16.vlgmr.msra.gmra.mxu0 %v548_v45 }
 0x27e   :  { %1768 = vmatprep.mubr.msk.bf16.mxu0 %vm2112_vm0, %v2111_v0  ;;  %1753 = vmatpush3.bf16.msra.mxu0 %v1909_v55  ;;  %v1924_v55 = vld [vmem:[#allocation5] sm:$0xff]  }
 0x27f   :  { %1754 = vmatprep.subr.bf16.mxu0 %v2111_v0 }
 0x282   :  { %1755 = vmatpush3.bf16.msra.mxu0 %v1910_v56  ;;  %v1561_v56 = vld [vmem:[%s2525_s3] ss:$0 sm:$0xff] }
 0x283   :  { %1756 = vmatprep.subr.bf16.mxu0 %v2111_v0 }
 0x286   :  { %1757 = vmatpush3.bf16.msra.mxu0 %v1911_v57 }
 0x287   :  { %1758 = vmatprep.subr.bf16.mxu0 %v2111_v0 }
 0x28a   :  { %1759 = vmatpush3.bf16.msra.mxu0 %v1912_v58 }
 0x28b   :  { %1760 = vmatprep.subr.bf16.mxu0 %v2111_v0 }
 0x28e   :  { %1761 = vmatpush3.bf16.msra.mxu0 %v1913_v59 }
 0x28f   :  { %1762 = vmatprep.subr.bf16.mxu0 %v2111_v0 }
 0x292   :  { %1763 = vmatpush3.bf16.msra.mxu0 %v1914_v60 }
 0x293   :  { %1764 = vmatprep.subr.bf16.mxu0 %v2111_v0 }
 0x296   :  { %1765 = vmatpush3.bf16.msra.mxu0 %v1915_v61 }
 0x297   :  { %1766 = vmatprep.subr.bf16.mxu0 %v2111_v0 }
 0x29a   :  { %1767 = vmatpush3.bf16.msra.mxu0 %v1916_v38  ;;  %v1931_v38 = vld [vmem:[#allocation7 + $0x8] sm:$0xff]  }
 0x29b   :  { %1792 = vmatprep.subr.bf16.mxu0 %v2111_v0 }
 0x33d   :  { %v654_v63 = vpop.f32.mrf.mxu0 }
 0x33e   :  { %v655_v1 = vadd.f32 %v1542_v62, %v654_v63 }
 0x33f   :  { %v1730_v2 = vpop.f32.mrf.mxu0 }
 0x340   :  { %v661_v3 = vrot.slane %v655_v1, 4  ;;  %v668_v4 = vmul.f32 %v655_v1, %v655_v1 }
 0x341   :  { %v657_v5 = vpop.f32.mrf.mxu0 }
 0x342   :  { %v662_v6 = vadd.f32 %v661_v3, %v655_v1  ;;  %v670_v7 = vrot.slane %v668_v4, 4 }
 0x343   :  { %v1731_v8 = vpop.f32.mrf.mxu0 }
 0x344   :  { %v663_v9 = vrot.slane %v662_v6, 2  ;;  %v671_v10 = vadd.f32 %v670_v7, %v668_v4 }
 0x346   :  { %v664_v11 = vadd.f32 %v663_v9, %v662_v6  ;;  %v672_v12 = vrot.slane %v671_v10, 2 }
 0x348   :  { %v665_v13 = vrot.slane %v664_v11, 1  ;;  %v673_v14 = vadd.f32 %v672_v12, %v671_v10 }
 0x34a   :  { %v666_v15 = vadd.f32 %v665_v13, %v664_v11  ;;  %v674_v16 = vrot.slane %v673_v14, 1 }
 0x34c   :  { %v667_v17 = vmul.f32 0.125, %v666_v15  ;;  %v675_v18 = vadd.f32 %v674_v16, %v673_v14 }
 0x34e   :  { %v676_v19 = vmul.f32 0.125, %v675_v18  ;;  %v677_v20 = vmul.f32 %v667_v17, %v667_v17  ;;  %v956_v18 = vld [vmem:[%s2526_s8] sm:$0x1] }
 0x350   :  { %v678_v21 = vsub.f32 %v676_v19, %v677_v20 }
 0x352   :  { %v679_v22 = vmax.f32 %v678_v21, 0.0  ;;  %v960_v21 = vld [vmem:[%s2527_s14] sm:$0x1] }
 0x354   :  { %v681_v23 = vadd.f32 1e-05, %v679_v22 }
 0x356   :  { %1945 = vrsqrt.f32 %v681_v23 }
 0x363   :  { %v1946_v25 = vpop.eup %1945 }
 0x364   :  { %v683_v26 = vmul.f32 %v1946_v25, %v680_v24 }
 0x366   :  { %v685_v28 = vmul.f32 %v683_v26, %v667_v17  ;;  %v691_v29 = vrot.slane %v683_v26, %v2364_v47 }
 0x368   :  { %v686_v30 = vsub.f32 %v684_v27, %v685_v28  ;;  %v693_v31 = vmul.f32 %v691_v29, %v655_v1  ;;  %v1570_v27 = vld [vmem:[%s2528_s24] ss:$0 sm:$0xff] }
 0x36a   :  { %v698_v32 = vrot.slane %v686_v30, %v2364_v47 }
 0x36c   :  { %v700_v34 = vadd.f32 %v698_v32, %v693_v31  ;;  %v1925_v32 = vld [vmem:[#allocation7 + $0x38] sm:$0xff]  }
 0x36e   :  { %vm701_vm3 = vcmp.ge.f32.partialorder %v700_v34, 0.0  ;;  %v709_v35 = vmul.f32 %v1551_v33, %v700_v34  ;;  %v1926_v33 = vld [vmem:[#allocation7 + $0x30] sm:$0xff]  }
 0x370   :  { %v710_v36 = vsel %vm701_vm3, %v700_v34, %v709_v35  ;;  %v1927_v34 = vld [vmem:[#allocation7 + $0x28] sm:$0xff]   ;;  %v1928_v35 = vld [vmem:[#allocation7 + $0x20] sm:$0xff]  }
 0x371   :  { %v711_v37 = vpack.c.bf16 %v710_v36, %v710_v36  ;;  %v1929_v36 = vld [vmem:[#allocation7 + $0x18] sm:$0xff]  }
 0x373   :  { %1749 = vmatmul.mubr.bf16.vlgmr.msra.gmra.mxu1 %v711_v37  ;;  %v1930_v37 = vld [vmem:[#allocation7 + $0x10] sm:$0xff]  }
 0x374   :  { %1788 = vmatprep.mubr.msk.bf16.mxu1 %vm2112_vm0, %v2111_v0  ;;  %1773 = vmatpush3.bf16.msra.mxu1 %v1917_v48 }
 0x375   :  { %1774 = vmatprep.subr.bf16.mxu1 %v2111_v0 }
 0x378   :  { %1775 = vmatpush3.bf16.msra.mxu1 %v1918_v49 }
 0x379   :  { %1776 = vmatprep.subr.bf16.mxu1 %v2111_v0 }
 0x37c   :  { %1777 = vmatpush3.bf16.msra.mxu1 %v1919_v50 }
 0x37d   :  { %1778 = vmatprep.subr.bf16.mxu1 %v2111_v0 }
 0x380   :  { %1779 = vmatpush3.bf16.msra.mxu1 %v1920_v51 }
 0x381   :  { %1780 = vmatprep.subr.bf16.mxu1 %v2111_v0 }
 0x384   :  { %1781 = vmatpush3.bf16.msra.mxu1 %v1921_v52 }
 0x385   :  { %1782 = vmatprep.subr.bf16.mxu1 %v2111_v0 }
 0x388   :  { %1783 = vmatpush3.bf16.msra.mxu1 %v1922_v53 }
 0x389   :  { %1784 = vmatprep.subr.bf16.mxu1 %v2111_v0 }
 0x38c   :  { %1785 = vmatpush3.bf16.msra.mxu1 %v1923_v54 }
 0x38d   :  { %1786 = vmatprep.subr.bf16.mxu1 %v2111_v0 }
 0x390   :  { %1787 = vmatpush3.bf16.msra.mxu1 %v1924_v55 }
 0x391   :  { %1812 = vmatprep.subr.bf16.mxu1 %v2111_v0 }
 0x433   :  { %v817_v40 = vpop.f32.mrf.mxu1 }
 0x434   :  { %v818_v41 = vadd.f32 %v1552_v39, %v817_v40  ;;  %v1932_v39 = vld [vmem:[#allocation7] sm:$0xff]  }
 0x435   :  { %v1750_v42 = vpop.f32.mrf.mxu1  ;;  %v1571_v40 = vld [vmem:[%s2529_s6] ss:$0 sm:$0xff] }
 0x436   :  { %v824_v43 = vpack.c.bf16 %v818_v41, %v818_v41  ;;  %823 = vst [vmem:[#allocation10] sm:$0xff] %v818_v41 }
 0x437   :  { %v820_v45 = vpop.f32.mrf.mxu1 }
 0x438   :  { %1769 = vmatmul.mubr.bf16.vlgmr.msra.gmra.mxu0 %v824_v43 }
 0x439   :  { %v1751_v46 = vpop.f32.mrf.mxu1  ;;  %1808 = vmatprep.mubr.msk.bf16.mxu0 %vm2112_vm0, %v2111_v0  ;;  %1793 = vmatpush3.bf16.msra.mxu0 %v1925_v32 }
 0x43a   :  { %1794 = vmatprep.subr.bf16.mxu0 %v2111_v0 }
 0x43d   :  { %1795 = vmatpush3.bf16.msra.mxu0 %v1926_v33 }
 0x43e   :  { %1796 = vmatprep.subr.bf16.mxu0 %v2111_v0 }
 0x441   :  { %1797 = vmatpush3.bf16.msra.mxu0 %v1927_v34 }
 0x442   :  { %1798 = vmatprep.subr.bf16.mxu0 %v2111_v0 }
 0x445   :  { %1799 = vmatpush3.bf16.msra.mxu0 %v1928_v35 }
 0x446   :  { %1800 = vmatprep.subr.bf16.mxu0 %v2111_v0 }
 0x449   :  { %1801 = vmatpush3.bf16.msra.mxu0 %v1929_v36 }
 0x44a   :  { %1802 = vmatprep.subr.bf16.mxu0 %v2111_v0 }
 0x44d   :  { %1803 = vmatpush3.bf16.msra.mxu0 %v1930_v37 }
 0x44e   :  { %1804 = vmatprep.subr.bf16.mxu0 %v2111_v0 }
 0x451   :  { %1805 = vmatpush3.bf16.msra.mxu0 %v1931_v38 }
 0x452   :  { %1806 = vmatprep.subr.bf16.mxu0 %v2111_v0 }
 0x455   :  { %1807 = vmatpush3.bf16.msra.mxu0 %v1932_v39 }
 0x4f8   :  { %v930_v57 = vpop.f32.mrf.mxu0 }
 0x4f9   :  { %v931_v58 = vadd.f32 %v1561_v56, %v930_v57 }
 0x4fa   :  { %v1770_v59 = vpop.f32.mrf.mxu0 }
 0x4fb   :  { %v937_v60 = vrot.slane %v931_v58, 4  ;;  %v944_v61 = vmul.f32 %v931_v58, %v931_v58 }
 0x4fc   :  { %v933_v62 = vpop.f32.mrf.mxu0 }
 0x4fd   :  { %v938_v63 = vadd.f32 %v937_v60, %v931_v58  ;;  %v946_v1 = vrot.slane %v944_v61, 4 }
 0x4fe   :  { %v1771_v2 = vpop.f32.mrf.mxu0 }
 0x4ff   :  { %v939_v3 = vrot.slane %v938_v63, 2  ;;  %v947_v4 = vadd.f32 %v946_v1, %v944_v61 }
 0x501   :  { %v940_v5 = vadd.f32 %v939_v3, %v938_v63  ;;  %v948_v6 = vrot.slane %v947_v4, 2 }
 0x503   :  { %v941_v7 = vrot.slane %v940_v5, 1  ;;  %v949_v8 = vadd.f32 %v948_v6, %v947_v4  ;;  %v1119_v4 = vld [vmem:[%s2530_s12] sm:$0x1] }
 0x505   :  { %v942_v9 = vadd.f32 %v941_v7, %v940_v5  ;;  %v950_v10 = vrot.slane %v949_v8, 1  ;;  %v1123_v7 = vld [vmem:[%s2531_s4] sm:$0x1] }
 0x507   :  { %v943_v11 = vmul.f32 0.125, %v942_v9  ;;  %v951_v12 = vadd.f32 %v950_v10, %v949_v8 }
 0x509   :  { %v952_v13 = vmul.f32 0.125, %v951_v12  ;;  %v953_v14 = vmul.f32 %v943_v11, %v943_v11 }
 0x50b   :  { %v954_v15 = vsub.f32 %v952_v13, %v953_v14  ;;  %v1580_v13 = vld [vmem:[%s2532_s28] ss:$0 sm:$0xff] }
 0x50d   :  { %v955_v16 = vmax.f32 %v954_v15, 0.0 }
 0x50f   :  { %v957_v17 = vadd.f32 1e-05, %v955_v16 }
 0x511   :  { %1947 = vrsqrt.f32 %v957_v17 }
 0x51e   :  { %v1948_v19 = vpop.eup %1947 }
 0x51f   :  { %v959_v20 = vmul.f32 %v1948_v19, %v956_v18  ;;  %v1933_v18 = vld [vmem:[#allocation8 + $0x38] sm:$0xff]   ;;  %v1934_v19 = vld [vmem:[#allocation8 + $0x30] sm:$0xff]  }
 0x521   :  { %v961_v22 = vmul.f32 %v959_v20, %v943_v11  ;;  %v967_v23 = vrot.slane %v959_v20, %v2364_v47  ;;  %v1935_v20 = vld [vmem:[#allocation8 + $0x28] sm:$0xff]  }
 0x523   :  { %v962_v24 = vsub.f32 %v960_v21, %v961_v22  ;;  %v969_v25 = vmul.f32 %v967_v23, %v931_v58  ;;  %v1936_v21 = vld [vmem:[#allocation8 + $0x20] sm:$0xff]   ;;  %v1937_v22 = vld [vmem:[#allocation8 + $0x18] sm:$0xff]   ;;  %v1938_v23 = vld [vmem:[#allocation8 + $0x10] sm:$0xff]  }
 0x525   :  { %v974_v26 = vrot.slane %v962_v24, %v2364_v47  ;;  %v1939_v24 = vld [vmem:[#allocation8 + $0x8] sm:$0xff]  }
 0x527   :  { %v976_v28 = vadd.f32 %v974_v26, %v969_v25  ;;  %v1940_v25 = vld [vmem:[#allocation8] sm:$0xff]  }
 0x528   :  { %v1581_v26 = vld [vmem:[%s2533_s1] ss:$0 sm:$0xff] }
 0x529   :  { %vm977_vm4 = vcmp.ge.f32.partialorder %v976_v28, 0.0  ;;  %v985_v29 = vmul.f32 %v1570_v27, %v976_v28 }
 0x52b   :  { %v986_v30 = vsel %vm977_vm4, %v976_v28, %v985_v29 }
 0x52c   :  { %v987_v31 = vpack.c.bf16 %v986_v30, %v986_v30 }
 0x52e   :  { %1789 = vmatmul.mubr.bf16.vlgmr.msra.gmra.mxu1 %v987_v31 }
 0x52f   :  { %1828 = vmatprep.mubr.msk.bf16.mxu1 %vm2112_vm0, %v2111_v0  ;;  %1813 = vmatpush3.bf16.msra.mxu1 %v1933_v18 }
 0x530   :  { %1814 = vmatprep.subr.bf16.mxu1 %v2111_v0 }
 0x533   :  { %1815 = vmatpush3.bf16.msra.mxu1 %v1934_v19 }
 0x534   :  { %1816 = vmatprep.subr.bf16.mxu1 %v2111_v0 }
 0x537   :  { %1817 = vmatpush3.bf16.msra.mxu1 %v1935_v20 }
 0x538   :  { %1818 = vmatprep.subr.bf16.mxu1 %v2111_v0 }
 0x53b   :  { %1819 = vmatpush3.bf16.msra.mxu1 %v1936_v21 }
 0x53c   :  { %1820 = vmatprep.subr.bf16.mxu1 %v2111_v0 }
 0x53f   :  { %1821 = vmatpush3.bf16.msra.mxu1 %v1937_v22 }
 0x540   :  { %1822 = vmatprep.subr.bf16.mxu1 %v2111_v0 }
 0x543   :  { %1823 = vmatpush3.bf16.msra.mxu1 %v1938_v23 }
 0x544   :  { %1824 = vmatprep.subr.bf16.mxu1 %v2111_v0 }
 0x547   :  { %1825 = vmatpush3.bf16.msra.mxu1 %v1939_v24 }
 0x548   :  { %1826 = vmatprep.subr.bf16.mxu1 %v2111_v0 }
 0x54b   :  { %1827 = vmatpush3.bf16.msra.mxu1 %v1940_v25 }
 0x5ee   :  { %v1093_v41 = vpop.f32.mrf.mxu1 }
 0x5ef   :  { %v1094_v42 = vadd.f32 %v1571_v40, %v1093_v41 }
 0x5f0   :  { %v1790_v43 = vpop.f32.mrf.mxu1 }
 0x5f1   :  { %v1100_v45 = vrot.slane %v1094_v42, 4  ;;  %v1107_v46 = vmul.f32 %v1094_v42, %v1094_v42 }
 0x5f2   :  { %v1096_v48 = vpop.f32.mrf.mxu1 }
 0x5f3   :  { %v1101_v49 = vadd.f32 %v1100_v45, %v1094_v42  ;;  %v1109_v50 = vrot.slane %v1107_v46, 4 }
 0x5f4   :  { %v1791_v51 = vpop.f32.mrf.mxu1 }
 0x5f5   :  { %v1102_v52 = vrot.slane %v1101_v49, 2  ;;  %v1110_v53 = vadd.f32 %v1109_v50, %v1107_v46 }
 0x5f7   :  { %v1103_v54 = vadd.f32 %v1102_v52, %v1101_v49  ;;  %v1111_v55 = vrot.slane %v1110_v53, 2  ;;  %v1282_v52 = vld [vmem:[%s2534_s2] sm:$0x1] }
 0x5f9   :  { %v1104_v56 = vrot.slane %v1103_v54, 1  ;;  %v1112_v57 = vadd.f32 %v1111_v55, %v1110_v53  ;;  %v1286_v55 = vld [vmem:[%s2535_s7] sm:$0x1] }
 0x5fb   :  { %v1105_v58 = vadd.f32 %v1104_v56, %v1103_v54  ;;  %v1113_v59 = vrot.slane %v1112_v57, 1 }
 0x5fd   :  { %v1106_v60 = vmul.f32 0.125, %v1105_v58  ;;  %v1114_v61 = vadd.f32 %v1113_v59, %v1112_v57 }
 0x5ff   :  { %v1115_v62 = vmul.f32 0.125, %v1114_v61  ;;  %v1116_v63 = vmul.f32 %v1106_v60, %v1106_v60  ;;  %v1590_v61 = vld [vmem:[%s2536_s10] ss:$0 sm:$0xff] }
 0x601   :  { %v1117_v1 = vsub.f32 %v1115_v62, %v1116_v63 }
 0x603   :  { %v1118_v2 = vmax.f32 %v1117_v1, 0.0 }
 0x605   :  { %v1120_v3 = vadd.f32 1e-05, %v1118_v2 }
 0x607   :  { %1949 = vrsqrt.f32 %v1120_v3  ;;  %v1426_v3 = vand.u32 127, %v362_v44 }
 0x609   :  { %vm1427_vm7 = vcmp.ge.s32.totalorder %v1426_v3, 2  ;;  %vm1428_vm8 = vcmp.lt.s32.totalorder %v1426_v3, 7  ;;  %vm1445_vm10 = vcmp.ge.s32.totalorder %v1426_v3, 7  ;;  %vm1446_vm11 = vcmp.lt.s32.totalorder %v1426_v3, 14 }
 0x60a   :  { %vm2475_vm9 = vmand %vm1427_vm7, %vm1428_vm8 }
 0x60b   :  { %vm2481_vm12 = vmand %vm1445_vm10, %vm1446_vm11 }
 0x614   :  { %v1950_v5 = vpop.eup %1949 }
 0x615   :  { %v1122_v6 = vmul.f32 %v1950_v5, %v1119_v4  ;;  %v1591_v4 = vld [vmem:[%s2292_s30] ss:$0 sm:$0xff]  ;;  %s2113_s30 = smov [#allocation10]  }
 0x616   :  { %s1471_s11 = sshll.u32 %s2113_s30, 4  ;;  %s1472_s11 = int_to_ptr.vmem [resolvable:$true] %s1471_s11 }
 0x617   :  { %v1124_v8 = vmul.f32 %v1122_v6, %v1106_v60  ;;  %v1130_v9 = vrot.slane %v1122_v6, %v2364_v47  ;;  %s2041_s0 = scalar_lea.vmem %s1472_s11, 128  ;;  %p2046_p7 = scmp.lt.s32.totalorder %s1472_s11, %s1472_s11 }
 0x618   :  { %p2042_p6 = scmp.ne.s32.totalorder %s1472_s11, %s2041_s0  ;;  %p2047_p8 = scmp.lt.s32.totalorder %s2041_s0, %s2041_s0 }
 0x619   :  { %v1125_v10 = vsub.f32 %v1123_v7, %v1124_v8  ;;  %v1132_v11 = vmul.f32 %v1130_v9, %v1094_v42 }
 0x61a   :  { %p2048_p9 = por %p2047_p8, %p2046_p7 }
 0x61b   :  { %v1137_v12 = vrot.slane %v1125_v10, %v2364_v47 }
 0x61c   :  { %p2049_p10 = pnand %p2048_p9, %p2042_p6 }
 0x61d   :  { %v1139_v14 = vadd.f32 %v1137_v12, %v1132_v11 }
 0x61f   :  { %vm1140_vm5 = vcmp.ge.f32.partialorder %v1139_v14, 0.0  ;;  %v1148_v15 = vmul.f32 %v1580_v13, %v1139_v14 }
 0x621   :  { %v1149_v16 = vsel %vm1140_vm5, %v1139_v14, %v1148_v15 }
 0x622   :  { %v1150_v17 = vpack.c.bf16 %v1149_v16, %v1149_v16 }
 0x624   :  { %1809 = vmatmul.mubr.bf16.vlgmr.msra.gmra.mxu0 %v1150_v17 }
 0x6e4   :  { %v1256_v27 = vpop.f32.mrf.mxu0 }
 0x6e5   :  { %v1257_v28 = vadd.f32 %v1581_v26, %v1256_v27 }
 0x6e6   :  { %v1810_v29 = vpop.f32.mrf.mxu0 }
 0x6e7   :  { %v1263_v30 = vrot.slane %v1257_v28, 4  ;;  %v1270_v31 = vmul.f32 %v1257_v28, %v1257_v28 }
 0x6e8   :  { %v1259_v32 = vpop.f32.mrf.mxu0 }
 0x6e9   :  { %v1264_v33 = vadd.f32 %v1263_v30, %v1257_v28  ;;  %v1272_v34 = vrot.slane %v1270_v31, 4 }
 0x6ea   :  { %v1811_v35 = vpop.f32.mrf.mxu0 }
 0x6eb   :  { %v1265_v36 = vrot.slane %v1264_v33, 2  ;;  %v1273_v37 = vadd.f32 %v1272_v34, %v1270_v31 }
 0x6ed   :  { %v1266_v38 = vadd.f32 %v1265_v36, %v1264_v33  ;;  %v1274_v39 = vrot.slane %v1273_v37, 2 }
 0x6ef   :  { %v1267_v40 = vrot.slane %v1266_v38, 1  ;;  %v1275_v41 = vadd.f32 %v1274_v39, %v1273_v37 }
 0x6f1   :  { %v1268_v0 = vadd.f32 %v1267_v40, %v1266_v38  ;;  %v1276_v42 = vrot.slane %v1275_v41, 1 }
 0x6f3   :  { %v1269_v43 = vmul.f32 0.125, %v1268_v0  ;;  %v1277_v45 = vadd.f32 %v1276_v42, %v1275_v41 }
 0x6f5   :  { %v1278_v46 = vmul.f32 0.125, %v1277_v45  ;;  %v1279_v48 = vmul.f32 %v1269_v43, %v1269_v43 }
 0x6f7   :  { %v1280_v49 = vsub.f32 %v1278_v46, %v1279_v48 }
 0x6f9   :  { %v1281_v50 = vmax.f32 %v1280_v49, 0.0 }
 0x6fb   :  { %v1283_v51 = vadd.f32 1e-05, %v1281_v50 }
 0x6fd   :  { %1951 = vrsqrt.f32 %v1283_v51 }
 0x70a   :  { %v1952_v53 = vpop.eup %1951 }
 0x70b   :  { %v1285_v54 = vmul.f32 %v1952_v53, %v1282_v52 }
 0x70d   :  { %v1287_v56 = vmul.f32 %v1285_v54, %v1269_v43  ;;  %v1293_v57 = vrot.slane %v1285_v54, %v2364_v47 }
 0x70f   :  { %v1288_v58 = vsub.f32 %v1286_v55, %v1287_v56  ;;  %v1295_v59 = vmul.f32 %v1293_v57, %v1257_v28 }
 0x711   :  { %v1300_v60 = vrot.slane %v1288_v58, %v2364_v47 }
 0x713   :  { %v1302_v62 = vadd.f32 %v1300_v60, %v1295_v59 }
 0x715   :  { %vm1303_vm6 = vcmp.ge.f32.partialorder %v1302_v62, 0.0  ;;  %v1311_v63 = vmul.f32 %v1590_v61, %v1302_v62 }
 0x717   :  { %v1312_v1 = vsel %vm1303_vm6, %v1302_v62, %v1311_v63 }
 0x718   :  { %v1313_v2 = vpack.c.bf16 %v1312_v1, %v1312_v1 }
 0x71a   :  { %1829 = vmatmul.mubr.bf16.vlgmr.msra.gmra.mxu1 %v1313_v2 }
 0x7da   :  { %v1419_v5 = vpop.f32.mrf.mxu1 }
 0x7db   :  { %v1420_v7 = vadd.f32 %v1591_v4, %v1419_v5 }
 0x7dc   :  { %v1830_v47 = vpop.f32.mrf.mxu1 }
 0x7dd   :  { %v1432_v8 = vsel %vm2475_vm9, %v1420_v7, -inf  ;;  %v1450_v11 = vsel %vm2481_vm12, %v1420_v7, -inf }
 0x7de   :  { %1433 = vmax.xlane.f32.xlu0 %v1432_v8  ;;  %v1422_v9 = vpop.f32.mrf.mxu1 }
 0x7e0   :  { %v1831_v44 = vpop.f32.mrf.mxu1 }
 0x7e2   :  { %1451 = vmax.xlane.f32.xlu0 %v1450_v11 }
 0x867   :  { %v1434_v12 = vpop.xlane.xlu0 %1433 }
 0x868   :  { %v1435_v13 = vsub.f32 %v1420_v7, %v1434_v12 }
 0x86a   :  { %v1436_v14 = vsel %vm2475_vm9, %v1435_v13, -inf }
 0x86b   :  { %v1452_v15 = vpop.xlane.xlu0 %1451  ;;  %v1437_v16 = vmul.f32 1.442695, %v1436_v14 }
 0x86c   :  { %v1453_v17 = vsub.f32 %v1420_v7, %v1452_v15 }
 0x86d   :  { %1953 = vpow2.f32 %v1437_v16 }
 0x86e   :  { %v1454_v18 = vsel %vm2481_vm12, %v1453_v17, -inf }
 0x86f   :  { %v1455_v19 = vmul.f32 1.442695, %v1454_v18 }
 0x871   :  { %1955 = vpow2.f32 %v1455_v19 }
 0x87a   :  { %v1954_v20 = vpop.eup %1953 }
 0x87b   :  { %1439 = vadd.xlane.f32.xlu1 %v1954_v20 }
 0x87e   :  { %v1956_v21 = vpop.eup %1955 }
 0x87f   :  { %1457 = vadd.xlane.f32.xlu1 %v1956_v21 }
 0x880   :  { %2052 = shalt.err (!%p2049_p10)
}
 0x881   :  { %1474 = dma.vmem_to_hbm [thread:$0]  %s1472_s11, 128, %s2297_s27, [#allocation4]  }
 0x904   :  { %v1440_v22 = vpop.xlane.xlu1 %1439 }
 0x905   :  { %1957 = vlog2.f32 %v1440_v22 }
 0x908   :  { %v1458_v23 = vpop.xlane.xlu1 %1457 }
 0x909   :  { %1959 = vlog2.f32 %v1458_v23 }
 0x912   :  { %v1958_v24 = vpop.eup %1957 }
 0x913   :  { %v1442_v25 = vmul.f32 0.6931472, %v1958_v24 }
 0x915   :  { %v1443_v27 = vadd.f32 %v1442_v25, %v1434_v12 }
 0x916   :  { %v1960_v26 = vpop.eup %1959 }
 0x917   :  { %v1460_v28 = vmul.f32 0.6931472, %v1960_v26  ;;  %v1444_v30 = vsel %vm2475_vm9, %v1443_v27, 0.0 }
 0x919   :  { %v1461_v29 = vadd.f32 %v1460_v28, %v1452_v15 }
 0x91b   :  { %v1462_v31 = vsel %vm2481_vm12, %v1461_v29, %v1444_v30 }
 0x91c   :  { %v1463_v32 = vsub.f32 %v1420_v7, %v1462_v31 }
 0x91e   :  { %1464 = vst [vmem:[%s2302_s19] sm:$0xff] %v1463_v32 }
 0x91f   :  { %2067 = dma.done.wait [#allocation4], 128  }
 0x920   :  { %2068 = vsyncadd [#allocation4], 4294967168 }
 0x921   :  { %1482 = vsyncpa [#allocation3], 1 }
 0x922   :  { %1483 = vsyncpa [#allocation6], 1 }
 0x923   :  { %1484 = vsyncpa [#allocation9], 1 }
 0x924   :  { %1485 = vsyncpa [#allocation4], 1 }

</bundles_post_ra>
